<compile_context>
chip_gen: v7x
topology: tpu7x:2x2x1
jax: 0.10.0
libtpu: 0.0.40
codegen_flags: <defaults>
</compile_context>

<pallas_src>
import numpy as np
import jax
import jax.numpy as jnp
from jax import lax
from jax.experimental import pallas as pl
from jax.experimental.pallas import tpu as pltpu

EPS = 1e-5


def _make_kernel(H, W):
    HW = H * W
    offs = [(di, dj) for di in (-1, 0, 1) for dj in (-1, 0, 1)]

    def kernel(x_ref, m9_ref, w1t_ref, g1_ref, be1_ref, dwc_ref, g2_ref,
               be2_ref, w2t_ref, g3_ref, be3_ref, out_ref):
        B = x_ref.shape[0]
        inv_n = 1.0 / (B * HW)

        def bn_apply(ys, g, be, relu):
            # Training-mode batch stats (over batch + spatial) folded into a
            # single per-channel FMA; lane-axis sums are XLU reductions.
            s = jnp.sum(ys[0], axis=1, keepdims=True)
            s2 = jnp.sum(ys[0] * ys[0], axis=1, keepdims=True)
            for y in ys[1:]:
                s = s + jnp.sum(y, axis=1, keepdims=True)
                s2 = s2 + jnp.sum(y * y, axis=1, keepdims=True)
            mu = s * inv_n
            var = jnp.maximum(s2 * inv_n - mu * mu, 0.0)   # clamp f32 cancel
            scale = g * lax.rsqrt(var + EPS)
            shift = be - mu * scale
            if relu:
                return [jnp.maximum(y * scale + shift, 0.0) for y in ys]
            return [y * scale + shift for y in ys]

        # Hoisted per-tap constants: per-channel weights (Cmid,1) and
        # per-position boundary masks (1,HW), shared by all batches.
        dwc = dwc_ref[...]                                   # (Cmid, 9)
        m9 = m9_ref[...]                                     # (9, HW) f32
        wks = {}
        mfs = {}
        for k, (di, dj) in enumerate(offs):
            wks[(di, dj)] = dwc[:, k:k + 1]
            mfs[(di, dj)] = m9[k:k + 1, :]

        def dwconv3x3(y):                                    # y: (Cmid, HW)
            acc = y * wks[(0, 0)]                            # center tap
            for di, dj in offs:
                if di == 0 and dj == 0:
                    continue
                shift = (-(di * W + dj)) % HW
                t = pltpu.roll(y, shift, 1)                  # XLU lane rotate
                acc = acc + (t * wks[(di, dj)]) * mfs[(di, dj)]
            return acc

        x = x_ref[...]                                       # (B, Cout, HW)
        w1t = w1t_ref[...]                                   # (Cmid, Cout)
        w2t = w2t_ref[...]                                   # (Cout, Cmid)

        # pw1 (bias cancelled by BN) -> bn1 -> relu
        ys = [jnp.dot(w1t, x[b], preferred_element_type=jnp.float32)
              for b in range(B)]
        ys = bn_apply(ys, g1_ref[...], be1_ref[...], relu=True)

        # depthwise 3x3, padding=1 (bias cancelled) -> bn2 -> relu
        ys = [dwconv3x3(y) for y in ys]
        ys = bn_apply(ys, g2_ref[...], be2_ref[...], relu=True)

        # pw2 (bias cancelled) -> bn3
        zs = [jnp.dot(w2t, y, preferred_element_type=jnp.float32) for y in ys]
        zs = bn_apply(zs, g3_ref[...], be3_ref[...], relu=False)

        # Residual add (shortcut already zero-padded to Cout channels) and a
        # single full lane-dense store per batch.
        for b in range(B):
            out_ref[b] = zs[b] + x[b]

    return kernel


def _dw_masks(H, W):
    """(9, H*W) f32 tap-validity masks for a 3x3 'SAME' depthwise conv."""
    m = np.zeros((9, H * W), np.float32)
    k = 0
    for di in (-1, 0, 1):
        for dj in (-1, 0, 1):
            r = np.arange(H)[:, None] + di
            c = np.arange(W)[None, :] + dj
            valid = (r >= 0) & (r < H) & (c >= 0) & (c < W)
            m[k] = valid.astype(np.float32).reshape(-1)
            k += 1
    return m


def _padded_f32_bytes(shape):
    """f32 bytes after rounding last dim to 128 lanes, 2nd-to-last to 8."""
    s = list(shape)
    s[-1] = -(-s[-1] // 128) * 128
    if len(s) >= 2:
        s[-2] = -(-s[-2] // 8) * 8
    n = 1
    for d in s:
        n *= int(d)
    return 4 * n


def invbneck_forward(x_nchw, p):
    """x_nchw: (B, Cin, H, W) float32. Returns (B, Cout, H, W) float32."""
    B, Cin, H, W = x_nchw.shape
    HW = H * W
    Cmid = p["w1"].shape[1]
    Cout = p["w2"].shape[1]
    assert Cout >= Cin, "channel zero-padding of shortcut requires Cout >= Cin"

    # Lane-dense layout: (B, C, H*W) is a pure reshape of NCHW (no transpose).
    # Fold the shortcut's zero-channel padding into the input once (and zero
    # columns into w1^T) so the in-kernel residual add is channel-aligned.
    x = x_nchw.reshape(B, Cin, HW).astype(jnp.float32)
    w1t = p["w1"].astype(jnp.float32).T                        # (Cmid, Cin)
    if Cout > Cin:
        x = jnp.pad(x, ((0, 0), (0, Cout - Cin), (0, 0)))
        w1t = jnp.pad(w1t, ((0, 0), (0, Cout - Cin)))
    w2t = p["w2"].astype(jnp.float32).T                        # (Cout, Cmid)
    dwc = p["dw"].astype(jnp.float32).T                        # (Cmid, 9)
    m9 = jnp.asarray(_dw_masks(H, W))                          # (9, HW)

    inputs = (x, m9, w1t,
              p["g1"].reshape(Cmid, 1), p["be1"].reshape(Cmid, 1),
              dwc,
              p["g2"].reshape(Cmid, 1), p["be2"].reshape(Cmid, 1),
              w2t,
              p["g3"].reshape(Cout, 1), p["be3"].reshape(Cout, 1))

    # VMEM budget from (8,128)-padded tile footprints (whole problem resident
    # at these toy shapes; see TODO about tiling for production shapes).
    est = sum(_padded_f32_bytes(a.shape) for a in inputs)
    est += _padded_f32_bytes((B, Cout, HW))                    # output
    est += (3 * B + 4) * _padded_f32_bytes((Cmid, HW))         # live temps
    vmem_limit = int(min(48 * 1024 * 1024, max(32 * 1024 * 1024, 2 * est)))

    vmem = pl.BlockSpec(memory_space=pltpu.MemorySpace.VMEM)
    out = pl.pallas_call(
        _make_kernel(H, W),
        out_shape=jax.ShapeDtypeStruct((B, Cout, HW), jnp.float32),
        in_specs=[vmem] * len(inputs),
        out_specs=vmem,
        compiler_params=pltpu.CompilerParams(vmem_limit_bytes=vmem_limit),
    )(*inputs)
    return out.reshape(B, Cout, H, W)


def init_params(key, in_channels, out_channels, kernel=3, channel_factor=2):
    Cin, Cout = in_channels, out_channels
    Cmid = out_channels * channel_factor
    ks = jax.random.split(key, 12)
    return {
        "w1":  0.2 * jax.random.normal(ks[0], (Cin, Cmid), jnp.float32),
        "b1":  0.1 * jax.random.normal(ks[1], (1, Cmid), jnp.float32),
        "g1":  1.0 + 0.1 * jax.random.normal(ks[2], (1, Cmid), jnp.float32),
        "be1": 0.1 * jax.random.normal(ks[3], (1, Cmid), jnp.float32),
        "dw":  0.2 * jax.random.normal(ks[4], (kernel * kernel, Cmid), jnp.float32),
        "bdw": 0.1 * jax.random.normal(ks[5], (1, Cmid), jnp.float32),
        "g2":  1.0 + 0.1 * jax.random.normal(ks[6], (1, Cmid), jnp.float32),
        "be2": 0.1 * jax.random.normal(ks[7], (1, Cmid), jnp.float32),
        "w2":  0.2 * jax.random.normal(ks[8], (Cmid, Cout), jnp.float32),
        "b2":  0.1 * jax.random.normal(ks[9], (1, Cout), jnp.float32),
        "g3":  1.0 + 0.1 * jax.random.normal(ks[10], (1, Cout), jnp.float32),
        "be3": 0.1 * jax.random.normal(ks[11], (1, Cout), jnp.float32),
    }


def reference(x_nchw, p):
    """Pure-JAX reference using lax convs (training-mode BN, biases included)."""
    x = jnp.transpose(x_nchw, (0, 2, 3, 1)).astype(jnp.float32)
    Cin = x.shape[-1]
    Cmid = p["w1"].shape[1]
    Cout = p["w2"].shape[1]
    dn = ("NHWC", "HWIO", "NHWC")

    def bn(y, g, b):
        mu = jnp.mean(y, axis=(0, 1, 2), keepdims=True)
        var = jnp.mean((y - mu) ** 2, axis=(0, 1, 2), keepdims=True)
        return (y - mu) / jnp.sqrt(var + EPS) * g.reshape(1, 1, 1, -1) + b.reshape(1, 1, 1, -1)

    y = lax.conv_general_dilated(x, p["w1"].reshape(1, 1, Cin, Cmid), (1, 1), "SAME",
                                 dimension_numbers=dn) + p["b1"].reshape(1, 1, 1, -1)
    y = jnp.maximum(bn(y, p["g1"], p["be1"]), 0.0)
    y = lax.conv_general_dilated(y, p["dw"].reshape(3, 3, 1, Cmid), (1, 1), "SAME",
                                 dimension_numbers=dn,
                                 feature_group_count=Cmid) + p["bdw"].reshape(1, 1, 1, -1)
    y = jnp.maximum(bn(y, p["g2"], p["be2"]), 0.0)
    z = lax.conv_general_dilated(y, p["w2"].reshape(1, 1, Cmid, Cout), (1, 1), "SAME",
                                 dimension_numbers=dn) + p["b2"].reshape(1, 1, 1, -1)
    z = bn(z, p["g3"], p["be3"])
    sc = x if Cout == Cin else jnp.pad(x, ((0, 0), (0, 0), (0, 0), (0, Cout - Cin)))
    return jnp.transpose(z + sc, (0, 3, 1, 2))


if __name__ == "__main__":
    key = jax.random.PRNGKey(0)
    kx, kp = jax.random.split(key)
    B, Cin, H, W = 2, 4, 16, 16
    out_channels = 8

    x = jax.random.normal(kx, (B, Cin, H, W), jnp.float32)
    params = init_params(kp, Cin, out_channels)

    y = invbneck_forward(x, params)
    y = jax.block_until_ready(y)

    y_ref = reference(x, params)
    assert y.shape == (B, out_channels, H, W)
    assert bool(jnp.allclose(y, y_ref, atol=2e-3, rtol=2e-3)), (
        "max abs err = %g" % float(jnp.max(jnp.abs(y - y_ref))))
    print("KERNEL_OK")
</pallas_src>

<mosaic_0001>
module attributes {stable_mosaic.version = 11 : i64} {
  func.func @kernel(%arg0: memref<2x8x256xf32, #tpu.memory_space<vmem>>, %arg1: memref<9x256xf32, #tpu.memory_space<vmem>>, %arg2: memref<16x8xf32, #tpu.memory_space<vmem>>, %arg3: memref<16x1xf32, #tpu.memory_space<vmem>>, %arg4: memref<16x1xf32, #tpu.memory_space<vmem>>, %arg5: memref<16x9xf32, #tpu.memory_space<vmem>>, %arg6: memref<16x1xf32, #tpu.memory_space<vmem>>, %arg7: memref<16x1xf32, #tpu.memory_space<vmem>>, %arg8: memref<8x16xf32, #tpu.memory_space<vmem>>, %arg9: memref<8x1xf32, #tpu.memory_space<vmem>>, %arg10: memref<8x1xf32, #tpu.memory_space<vmem>>, %arg11: memref<2x8x256xf32, #tpu.memory_space<vmem>>) attributes {dimension_semantics = [], scalar_prefetch = 0 : i64, scratch_operands = 0 : i64, tpu.core_type = #tpu.core_type<tc>} {
    %c0 = arith.constant 0 : index
    %c0_0 = arith.constant 0 : index
    %0 = vector.load %arg5[%c0, %c0_0] : memref<16x9xf32, #tpu.memory_space<vmem>>, vector<16x9xf32>
    %c0_1 = arith.constant 0 : index
    %c0_2 = arith.constant 0 : index
    %1 = vector.load %arg1[%c0_1, %c0_2] : memref<9x256xf32, #tpu.memory_space<vmem>>, vector<9x256xf32>
    %2 = vector.extract_strided_slice %0 {offsets = [0, 0], sizes = [16, 1], strides = [1, 1]} : vector<16x9xf32> to vector<16x1xf32>
    %3 = vector.extract_strided_slice %1 {offsets = [0, 0], sizes = [1, 256], strides = [1, 1]} : vector<9x256xf32> to vector<1x256xf32>
    %4 = vector.extract_strided_slice %0 {offsets = [0, 1], sizes = [16, 1], strides = [1, 1]} : vector<16x9xf32> to vector<16x1xf32>
    %5 = vector.extract_strided_slice %1 {offsets = [1, 0], sizes = [1, 256], strides = [1, 1]} : vector<9x256xf32> to vector<1x256xf32>
    %6 = vector.extract_strided_slice %0 {offsets = [0, 2], sizes = [16, 1], strides = [1, 1]} : vector<16x9xf32> to vector<16x1xf32>
    %7 = vector.extract_strided_slice %1 {offsets = [2, 0], sizes = [1, 256], strides = [1, 1]} : vector<9x256xf32> to vector<1x256xf32>
    %8 = vector.extract_strided_slice %0 {offsets = [0, 3], sizes = [16, 1], strides = [1, 1]} : vector<16x9xf32> to vector<16x1xf32>
    %9 = vector.extract_strided_slice %1 {offsets = [3, 0], sizes = [1, 256], strides = [1, 1]} : vector<9x256xf32> to vector<1x256xf32>
    %10 = vector.extract_strided_slice %0 {offsets = [0, 4], sizes = [16, 1], strides = [1, 1]} : vector<16x9xf32> to vector<16x1xf32>
    %11 = vector.extract_strided_slice %0 {offsets = [0, 5], sizes = [16, 1], strides = [1, 1]} : vector<16x9xf32> to vector<16x1xf32>
    %12 = vector.extract_strided_slice %1 {offsets = [5, 0], sizes = [1, 256], strides = [1, 1]} : vector<9x256xf32> to vector<1x256xf32>
    %13 = vector.extract_strided_slice %0 {offsets = [0, 6], sizes = [16, 1], strides = [1, 1]} : vector<16x9xf32> to vector<16x1xf32>
    %14 = vector.extract_strided_slice %1 {offsets = [6, 0], sizes = [1, 256], strides = [1, 1]} : vector<9x256xf32> to vector<1x256xf32>
    %15 = vector.extract_strided_slice %0 {offsets = [0, 7], sizes = [16, 1], strides = [1, 1]} : vector<16x9xf32> to vector<16x1xf32>
    %16 = vector.extract_strided_slice %1 {offsets = [7, 0], sizes = [1, 256], strides = [1, 1]} : vector<9x256xf32> to vector<1x256xf32>
    %17 = vector.extract_strided_slice %0 {offsets = [0, 8], sizes = [16, 1], strides = [1, 1]} : vector<16x9xf32> to vector<16x1xf32>
    %18 = vector.extract_strided_slice %1 {offsets = [8, 0], sizes = [1, 256], strides = [1, 1]} : vector<9x256xf32> to vector<1x256xf32>
    %c0_3 = arith.constant 0 : index
    %c0_4 = arith.constant 0 : index
    %c0_5 = arith.constant 0 : index
    %19 = vector.load %arg0[%c0_3, %c0_4, %c0_5] : memref<2x8x256xf32, #tpu.memory_space<vmem>>, vector<2x8x256xf32>
    %c0_6 = arith.constant 0 : index
    %c0_7 = arith.constant 0 : index
    %20 = vector.load %arg2[%c0_6, %c0_7] : memref<16x8xf32, #tpu.memory_space<vmem>>, vector<16x8xf32>
    %c0_8 = arith.constant 0 : index
    %c0_9 = arith.constant 0 : index
    %21 = vector.load %arg8[%c0_8, %c0_9] : memref<8x16xf32, #tpu.memory_space<vmem>>, vector<8x16xf32>
    %22 = vector.extract_strided_slice %19 {offsets = [0, 0, 0], sizes = [1, 8, 256], strides = [1, 1, 1]} : vector<2x8x256xf32> to vector<1x8x256xf32>
    %23 = vector.shape_cast %22 : vector<1x8x256xf32> to vector<8x256xf32>
    %cst = arith.constant dense<0.000000e+00> : vector<16x256xf32>
    %24 = tpu.matmul %20, %23, %cst {dimension_numbers = #tpu.dot_dimension_numbers<[1], [0], [0], [1], [0, 0, 1, 1], [], []>} : vector<16x8xf32>, vector<8x256xf32>, vector<16x256xf32> -> vector<16x256xf32>
    %25 = vector.extract_strided_slice %19 {offsets = [1, 0, 0], sizes = [1, 8, 256], strides = [1, 1, 1]} : vector<2x8x256xf32> to vector<1x8x256xf32>
    %26 = vector.shape_cast %25 : vector<1x8x256xf32> to vector<8x256xf32>
    %cst_10 = arith.constant dense<0.000000e+00> : vector<16x256xf32>
    %27 = tpu.matmul %20, %26, %cst_10 {dimension_numbers = #tpu.dot_dimension_numbers<[1], [0], [0], [1], [0, 0, 1, 1], [], []>} : vector<16x8xf32>, vector<8x256xf32>, vector<16x256xf32> -> vector<16x256xf32>
    %c0_11 = arith.constant 0 : index
    %c0_12 = arith.constant 0 : index
    %28 = vector.load %arg3[%c0_11, %c0_12] : memref<16x1xf32, #tpu.memory_space<vmem>>, vector<16x1xf32>
    %c0_13 = arith.constant 0 : index
    %c0_14 = arith.constant 0 : index
    %29 = vector.load %arg4[%c0_13, %c0_14] : memref<16x1xf32, #tpu.memory_space<vmem>>, vector<16x1xf32>
    %cst_15 = arith.constant dense<0.000000e+00> : vector<16xf32>
    %30 = vector.multi_reduction <add>, %24, %cst_15 [1] : vector<16x256xf32> to vector<16xf32>
    %31 = vector.shape_cast %30 : vector<16xf32> to vector<16x1xf32>
    %32 = arith.mulf %24, %24 : vector<16x256xf32>
    %cst_16 = arith.constant dense<0.000000e+00> : vector<16xf32>
    %33 = vector.multi_reduction <add>, %32, %cst_16 [1] : vector<16x256xf32> to vector<16xf32>
    %34 = vector.shape_cast %33 : vector<16xf32> to vector<16x1xf32>
    %cst_17 = arith.constant dense<0.000000e+00> : vector<16xf32>
    %35 = vector.multi_reduction <add>, %27, %cst_17 [1] : vector<16x256xf32> to vector<16xf32>
    %36 = vector.shape_cast %35 : vector<16xf32> to vector<16x1xf32>
    %37 = arith.addf %31, %36 : vector<16x1xf32>
    %38 = arith.mulf %27, %27 : vector<16x256xf32>
    %cst_18 = arith.constant dense<0.000000e+00> : vector<16xf32>
    %39 = vector.multi_reduction <add>, %38, %cst_18 [1] : vector<16x256xf32> to vector<16xf32>
    %40 = vector.shape_cast %39 : vector<16xf32> to vector<16x1xf32>
    %41 = arith.addf %34, %40 : vector<16x1xf32>
    %cst_19 = arith.constant 0.001953125 : f32
    %42 = vector.broadcast %cst_19 : f32 to vector<16x1xf32>
    %43 = arith.mulf %37, %42 : vector<16x1xf32>
    %cst_20 = arith.constant 0.001953125 : f32
    %44 = vector.broadcast %cst_20 : f32 to vector<16x1xf32>
    %45 = arith.mulf %41, %44 : vector<16x1xf32>
    %46 = arith.mulf %43, %43 : vector<16x1xf32>
    %47 = arith.subf %45, %46 : vector<16x1xf32>
    %cst_21 = arith.constant 0.000000e+00 : f32
    %48 = vector.broadcast %cst_21 : f32 to vector<16x1xf32>
    %49 = arith.maximumf %47, %48 : vector<16x1xf32>
    %cst_22 = arith.constant 9.99999974E-6 : f32
    %50 = vector.broadcast %cst_22 : f32 to vector<16x1xf32>
    %51 = arith.addf %49, %50 : vector<16x1xf32>
    %52 = math.rsqrt %51 : vector<16x1xf32>
    %53 = arith.mulf %28, %52 : vector<16x1xf32>
    %54 = arith.mulf %43, %53 : vector<16x1xf32>
    %55 = arith.subf %29, %54 : vector<16x1xf32>
    %56 = vector.broadcast %53 : vector<16x1xf32> to vector<16x256xf32>
    %57 = arith.mulf %24, %56 : vector<16x256xf32>
    %58 = vector.broadcast %55 : vector<16x1xf32> to vector<16x256xf32>
    %59 = arith.addf %57, %58 : vector<16x256xf32>
    %cst_23 = arith.constant 0.000000e+00 : f32
    %60 = vector.broadcast %cst_23 : f32 to vector<16x256xf32>
    %61 = arith.maximumf %59, %60 : vector<16x256xf32>
    %62 = vector.broadcast %53 : vector<16x1xf32> to vector<16x256xf32>
    %63 = arith.mulf %27, %62 : vector<16x256xf32>
    %64 = vector.broadcast %55 : vector<16x1xf32> to vector<16x256xf32>
    %65 = arith.addf %63, %64 : vector<16x256xf32>
    %cst_24 = arith.constant 0.000000e+00 : f32
    %66 = vector.broadcast %cst_24 : f32 to vector<16x256xf32>
    %67 = arith.maximumf %65, %66 : vector<16x256xf32>
    %68 = vector.broadcast %10 : vector<16x1xf32> to vector<16x256xf32>
    %69 = arith.mulf %61, %68 : vector<16x256xf32>
    %c17_i32 = arith.constant 17 : i32
    %70 = tpu.dynamic_rotate %61 by %c17_i32 dim 1 : vector<16x256xf32>, i32 -> vector<16x256xf32>
    %71 = vector.broadcast %2 : vector<16x1xf32> to vector<16x256xf32>
    %72 = arith.mulf %70, %71 : vector<16x256xf32>
    %73 = vector.broadcast %3 : vector<1x256xf32> to vector<16x256xf32>
    %74 = arith.mulf %72, %73 : vector<16x256xf32>
    %75 = arith.addf %69, %74 : vector<16x256xf32>
    %c16_i32 = arith.constant 16 : i32
    %76 = tpu.dynamic_rotate %61 by %c16_i32 dim 1 : vector<16x256xf32>, i32 -> vector<16x256xf32>
    %77 = vector.broadcast %4 : vector<16x1xf32> to vector<16x256xf32>
    %78 = arith.mulf %76, %77 : vector<16x256xf32>
    %79 = vector.broadcast %5 : vector<1x256xf32> to vector<16x256xf32>
    %80 = arith.mulf %78, %79 : vector<16x256xf32>
    %81 = arith.addf %75, %80 : vector<16x256xf32>
    %c15_i32 = arith.constant 15 : i32
    %82 = tpu.dynamic_rotate %61 by %c15_i32 dim 1 : vector<16x256xf32>, i32 -> vector<16x256xf32>
    %83 = vector.broadcast %6 : vector<16x1xf32> to vector<16x256xf32>
    %84 = arith.mulf %82, %83 : vector<16x256xf32>
    %85 = vector.broadcast %7 : vector<1x256xf32> to vector<16x256xf32>
    %86 = arith.mulf %84, %85 : vector<16x256xf32>
    %87 = arith.addf %81, %86 : vector<16x256xf32>
    %c1_i32 = arith.constant 1 : i32
    %88 = tpu.dynamic_rotate %61 by %c1_i32 dim 1 : vector<16x256xf32>, i32 -> vector<16x256xf32>
    %89 = vector.broadcast %8 : vector<16x1xf32> to vector<16x256xf32>
    %90 = arith.mulf %88, %89 : vector<16x256xf32>
    %91 = vector.broadcast %9 : vector<1x256xf32> to vector<16x256xf32>
    %92 = arith.mulf %90, %91 : vector<16x256xf32>
    %93 = arith.addf %87, %92 : vector<16x256xf32>
    %c255_i32 = arith.constant 255 : i32
    %94 = tpu.dynamic_rotate %61 by %c255_i32 dim 1 : vector<16x256xf32>, i32 -> vector<16x256xf32>
    %95 = vector.broadcast %11 : vector<16x1xf32> to vector<16x256xf32>
    %96 = arith.mulf %94, %95 : vector<16x256xf32>
    %97 = vector.broadcast %12 : vector<1x256xf32> to vector<16x256xf32>
    %98 = arith.mulf %96, %97 : vector<16x256xf32>
    %99 = arith.addf %93, %98 : vector<16x256xf32>
    %c241_i32 = arith.constant 241 : i32
    %100 = tpu.dynamic_rotate %61 by %c241_i32 dim 1 : vector<16x256xf32>, i32 -> vector<16x256xf32>
    %101 = vector.broadcast %13 : vector<16x1xf32> to vector<16x256xf32>
    %102 = arith.mulf %100, %101 : vector<16x256xf32>
    %103 = vector.broadcast %14 : vector<1x256xf32> to vector<16x256xf32>
    %104 = arith.mulf %102, %103 : vector<16x256xf32>
    %105 = arith.addf %99, %104 : vector<16x256xf32>
    %c240_i32 = arith.constant 240 : i32
    %106 = tpu.dynamic_rotate %61 by %c240_i32 dim 1 : vector<16x256xf32>, i32 -> vector<16x256xf32>
    %107 = vector.broadcast %15 : vector<16x1xf32> to vector<16x256xf32>
    %108 = arith.mulf %106, %107 : vector<16x256xf32>
    %109 = vector.broadcast %16 : vector<1x256xf32> to vector<16x256xf32>
    %110 = arith.mulf %108, %109 : vector<16x256xf32>
    %111 = arith.addf %105, %110 : vector<16x256xf32>
    %c239_i32 = arith.constant 239 : i32
    %112 = tpu.dynamic_rotate %61 by %c239_i32 dim 1 : vector<16x256xf32>, i32 -> vector<16x256xf32>
    %113 = vector.broadcast %17 : vector<16x1xf32> to vector<16x256xf32>
    %114 = arith.mulf %112, %113 : vector<16x256xf32>
    %115 = vector.broadcast %18 : vector<1x256xf32> to vector<16x256xf32>
    %116 = arith.mulf %114, %115 : vector<16x256xf32>
    %117 = arith.addf %111, %116 : vector<16x256xf32>
    %118 = vector.broadcast %10 : vector<16x1xf32> to vector<16x256xf32>
    %119 = arith.mulf %67, %118 : vector<16x256xf32>
    %c17_i32_25 = arith.constant 17 : i32
    %120 = tpu.dynamic_rotate %67 by %c17_i32_25 dim 1 : vector<16x256xf32>, i32 -> vector<16x256xf32>
    %121 = vector.broadcast %2 : vector<16x1xf32> to vector<16x256xf32>
    %122 = arith.mulf %120, %121 : vector<16x256xf32>
    %123 = vector.broadcast %3 : vector<1x256xf32> to vector<16x256xf32>
    %124 = arith.mulf %122, %123 : vector<16x256xf32>
    %125 = arith.addf %119, %124 : vector<16x256xf32>
    %c16_i32_26 = arith.constant 16 : i32
    %126 = tpu.dynamic_rotate %67 by %c16_i32_26 dim 1 : vector<16x256xf32>, i32 -> vector<16x256xf32>
    %127 = vector.broadcast %4 : vector<16x1xf32> to vector<16x256xf32>
    %128 = arith.mulf %126, %127 : vector<16x256xf32>
    %129 = vector.broadcast %5 : vector<1x256xf32> to vector<16x256xf32>
    %130 = arith.mulf %128, %129 : vector<16x256xf32>
    %131 = arith.addf %125, %130 : vector<16x256xf32>
    %c15_i32_27 = arith.constant 15 : i32
    %132 = tpu.dynamic_rotate %67 by %c15_i32_27 dim 1 : vector<16x256xf32>, i32 -> vector<16x256xf32>
    %133 = vector.broadcast %6 : vector<16x1xf32> to vector<16x256xf32>
    %134 = arith.mulf %132, %133 : vector<16x256xf32>
    %135 = vector.broadcast %7 : vector<1x256xf32> to vector<16x256xf32>
    %136 = arith.mulf %134, %135 : vector<16x256xf32>
    %137 = arith.addf %131, %136 : vector<16x256xf32>
    %c1_i32_28 = arith.constant 1 : i32
    %138 = tpu.dynamic_rotate %67 by %c1_i32_28 dim 1 : vector<16x256xf32>, i32 -> vector<16x256xf32>
    %139 = vector.broadcast %8 : vector<16x1xf32> to vector<16x256xf32>
    %140 = arith.mulf %138, %139 : vector<16x256xf32>
    %141 = vector.broadcast %9 : vector<1x256xf32> to vector<16x256xf32>
    %142 = arith.mulf %140, %141 : vector<16x256xf32>
    %143 = arith.addf %137, %142 : vector<16x256xf32>
    %c255_i32_29 = arith.constant 255 : i32
    %144 = tpu.dynamic_rotate %67 by %c255_i32_29 dim 1 : vector<16x256xf32>, i32 -> vector<16x256xf32>
    %145 = vector.broadcast %11 : vector<16x1xf32> to vector<16x256xf32>
    %146 = arith.mulf %144, %145 : vector<16x256xf32>
    %147 = vector.broadcast %12 : vector<1x256xf32> to vector<16x256xf32>
    %148 = arith.mulf %146, %147 : vector<16x256xf32>
    %149 = arith.addf %143, %148 : vector<16x256xf32>
    %c241_i32_30 = arith.constant 241 : i32
    %150 = tpu.dynamic_rotate %67 by %c241_i32_30 dim 1 : vector<16x256xf32>, i32 -> vector<16x256xf32>
    %151 = vector.broadcast %13 : vector<16x1xf32> to vector<16x256xf32>
    %152 = arith.mulf %150, %151 : vector<16x256xf32>
    %153 = vector.broadcast %14 : vector<1x256xf32> to vector<16x256xf32>
    %154 = arith.mulf %152, %153 : vector<16x256xf32>
    %155 = arith.addf %149, %154 : vector<16x256xf32>
    %c240_i32_31 = arith.constant 240 : i32
    %156 = tpu.dynamic_rotate %67 by %c240_i32_31 dim 1 : vector<16x256xf32>, i32 -> vector<16x256xf32>
    %157 = vector.broadcast %15 : vector<16x1xf32> to vector<16x256xf32>
    %158 = arith.mulf %156, %157 : vector<16x256xf32>
    %159 = vector.broadcast %16 : vector<1x256xf32> to vector<16x256xf32>
    %160 = arith.mulf %158, %159 : vector<16x256xf32>
    %161 = arith.addf %155, %160 : vector<16x256xf32>
    %c239_i32_32 = arith.constant 239 : i32
    %162 = tpu.dynamic_rotate %67 by %c239_i32_32 dim 1 : vector<16x256xf32>, i32 -> vector<16x256xf32>
    %163 = vector.broadcast %17 : vector<16x1xf32> to vector<16x256xf32>
    %164 = arith.mulf %162, %163 : vector<16x256xf32>
    %165 = vector.broadcast %18 : vector<1x256xf32> to vector<16x256xf32>
    %166 = arith.mulf %164, %165 : vector<16x256xf32>
    %167 = arith.addf %161, %166 : vector<16x256xf32>
    %c0_33 = arith.constant 0 : index
    %c0_34 = arith.constant 0 : index
    %168 = vector.load %arg6[%c0_33, %c0_34] : memref<16x1xf32, #tpu.memory_space<vmem>>, vector<16x1xf32>
    %c0_35 = arith.constant 0 : index
    %c0_36 = arith.constant 0 : index
    %169 = vector.load %arg7[%c0_35, %c0_36] : memref<16x1xf32, #tpu.memory_space<vmem>>, vector<16x1xf32>
    %cst_37 = arith.constant dense<0.000000e+00> : vector<16xf32>
    %170 = vector.multi_reduction <add>, %117, %cst_37 [1] : vector<16x256xf32> to vector<16xf32>
    %171 = vector.shape_cast %170 : vector<16xf32> to vector<16x1xf32>
    %172 = arith.mulf %117, %117 : vector<16x256xf32>
    %cst_38 = arith.constant dense<0.000000e+00> : vector<16xf32>
    %173 = vector.multi_reduction <add>, %172, %cst_38 [1] : vector<16x256xf32> to vector<16xf32>
    %174 = vector.shape_cast %173 : vector<16xf32> to vector<16x1xf32>
    %cst_39 = arith.constant dense<0.000000e+00> : vector<16xf32>
    %175 = vector.multi_reduction <add>, %167, %cst_39 [1] : vector<16x256xf32> to vector<16xf32>
    %176 = vector.shape_cast %175 : vector<16xf32> to vector<16x1xf32>
    %177 = arith.addf %171, %176 : vector<16x1xf32>
    %178 = arith.mulf %167, %167 : vector<16x256xf32>
    %cst_40 = arith.constant dense<0.000000e+00> : vector<16xf32>
    %179 = vector.multi_reduction <add>, %178, %cst_40 [1] : vector<16x256xf32> to vector<16xf32>
    %180 = vector.shape_cast %179 : vector<16xf32> to vector<16x1xf32>
    %181 = arith.addf %174, %180 : vector<16x1xf32>
    %cst_41 = arith.constant 0.001953125 : f32
    %182 = vector.broadcast %cst_41 : f32 to vector<16x1xf32>
    %183 = arith.mulf %177, %182 : vector<16x1xf32>
    %cst_42 = arith.constant 0.001953125 : f32
    %184 = vector.broadcast %cst_42 : f32 to vector<16x1xf32>
    %185 = arith.mulf %181, %184 : vector<16x1xf32>
    %186 = arith.mulf %183, %183 : vector<16x1xf32>
    %187 = arith.subf %185, %186 : vector<16x1xf32>
    %cst_43 = arith.constant 0.000000e+00 : f32
    %188 = vector.broadcast %cst_43 : f32 to vector<16x1xf32>
    %189 = arith.maximumf %187, %188 : vector<16x1xf32>
    %cst_44 = arith.constant 9.99999974E-6 : f32
    %190 = vector.broadcast %cst_44 : f32 to vector<16x1xf32>
    %191 = arith.addf %189, %190 : vector<16x1xf32>
    %192 = math.rsqrt %191 : vector<16x1xf32>
    %193 = arith.mulf %168, %192 : vector<16x1xf32>
    %194 = arith.mulf %183, %193 : vector<16x1xf32>
    %195 = arith.subf %169, %194 : vector<16x1xf32>
    %196 = vector.broadcast %193 : vector<16x1xf32> to vector<16x256xf32>
    %197 = arith.mulf %117, %196 : vector<16x256xf32>
    %198 = vector.broadcast %195 : vector<16x1xf32> to vector<16x256xf32>
    %199 = arith.addf %197, %198 : vector<16x256xf32>
    %cst_45 = arith.constant 0.000000e+00 : f32
    %200 = vector.broadcast %cst_45 : f32 to vector<16x256xf32>
    %201 = arith.maximumf %199, %200 : vector<16x256xf32>
    %202 = vector.broadcast %193 : vector<16x1xf32> to vector<16x256xf32>
    %203 = arith.mulf %167, %202 : vector<16x256xf32>
    %204 = vector.broadcast %195 : vector<16x1xf32> to vector<16x256xf32>
    %205 = arith.addf %203, %204 : vector<16x256xf32>
    %cst_46 = arith.constant 0.000000e+00 : f32
    %206 = vector.broadcast %cst_46 : f32 to vector<16x256xf32>
    %207 = arith.maximumf %205, %206 : vector<16x256xf32>
    %cst_47 = arith.constant dense<0.000000e+00> : vector<8x256xf32>
    %208 = tpu.matmul %21, %201, %cst_47 {dimension_numbers = #tpu.dot_dimension_numbers<[1], [0], [0], [1], [0, 0, 1, 1], [], []>} : vector<8x16xf32>, vector<16x256xf32>, vector<8x256xf32> -> vector<8x256xf32>
    %cst_48 = arith.constant dense<0.000000e+00> : vector<8x256xf32>
    %209 = tpu.matmul %21, %207, %cst_48 {dimension_numbers = #tpu.dot_dimension_numbers<[1], [0], [0], [1], [0, 0, 1, 1], [], []>} : vector<8x16xf32>, vector<16x256xf32>, vector<8x256xf32> -> vector<8x256xf32>
    %c0_49 = arith.constant 0 : index
    %c0_50 = arith.constant 0 : index
    %210 = vector.load %arg9[%c0_49, %c0_50] : memref<8x1xf32, #tpu.memory_space<vmem>>, vector<8x1xf32>
    %c0_51 = arith.constant 0 : index
    %c0_52 = arith.constant 0 : index
    %211 = vector.load %arg10[%c0_51, %c0_52] : memref<8x1xf32, #tpu.memory_space<vmem>>, vector<8x1xf32>
    %cst_53 = arith.constant dense<0.000000e+00> : vector<8xf32>
    %212 = vector.multi_reduction <add>, %208, %cst_53 [1] : vector<8x256xf32> to vector<8xf32>
    %213 = vector.shape_cast %212 : vector<8xf32> to vector<8x1xf32>
    %214 = arith.mulf %208, %208 : vector<8x256xf32>
    %cst_54 = arith.constant dense<0.000000e+00> : vector<8xf32>
    %215 = vector.multi_reduction <add>, %214, %cst_54 [1] : vector<8x256xf32> to vector<8xf32>
    %216 = vector.shape_cast %215 : vector<8xf32> to vector<8x1xf32>
    %cst_55 = arith.constant dense<0.000000e+00> : vector<8xf32>
    %217 = vector.multi_reduction <add>, %209, %cst_55 [1] : vector<8x256xf32> to vector<8xf32>
    %218 = vector.shape_cast %217 : vector<8xf32> to vector<8x1xf32>
    %219 = arith.addf %213, %218 : vector<8x1xf32>
    %220 = arith.mulf %209, %209 : vector<8x256xf32>
    %cst_56 = arith.constant dense<0.000000e+00> : vector<8xf32>
    %221 = vector.multi_reduction <add>, %220, %cst_56 [1] : vector<8x256xf32> to vector<8xf32>
    %222 = vector.shape_cast %221 : vector<8xf32> to vector<8x1xf32>
    %223 = arith.addf %216, %222 : vector<8x1xf32>
    %cst_57 = arith.constant 0.001953125 : f32
    %224 = vector.broadcast %cst_57 : f32 to vector<8x1xf32>
    %225 = arith.mulf %219, %224 : vector<8x1xf32>
    %cst_58 = arith.constant 0.001953125 : f32
    %226 = vector.broadcast %cst_58 : f32 to vector<8x1xf32>
    %227 = arith.mulf %223, %226 : vector<8x1xf32>
    %228 = arith.mulf %225, %225 : vector<8x1xf32>
    %229 = arith.subf %227, %228 : vector<8x1xf32>
    %cst_59 = arith.constant 0.000000e+00 : f32
    %230 = vector.broadcast %cst_59 : f32 to vector<8x1xf32>
    %231 = arith.maximumf %229, %230 : vector<8x1xf32>
    %cst_60 = arith.constant 9.99999974E-6 : f32
    %232 = vector.broadcast %cst_60 : f32 to vector<8x1xf32>
    %233 = arith.addf %231, %232 : vector<8x1xf32>
    %234 = math.rsqrt %233 : vector<8x1xf32>
    %235 = arith.mulf %210, %234 : vector<8x1xf32>
    %236 = arith.mulf %225, %235 : vector<8x1xf32>
    %237 = arith.subf %211, %236 : vector<8x1xf32>
    %238 = vector.broadcast %235 : vector<8x1xf32> to vector<8x256xf32>
    %239 = arith.mulf %208, %238 : vector<8x256xf32>
    %240 = vector.broadcast %237 : vector<8x1xf32> to vector<8x256xf32>
    %241 = arith.addf %239, %240 : vector<8x256xf32>
    %242 = vector.broadcast %235 : vector<8x1xf32> to vector<8x256xf32>
    %243 = arith.mulf %209, %242 : vector<8x256xf32>
    %244 = vector.broadcast %237 : vector<8x1xf32> to vector<8x256xf32>
    %245 = arith.addf %243, %244 : vector<8x256xf32>
    %246 = vector.extract_strided_slice %19 {offsets = [0, 0, 0], sizes = [1, 8, 256], strides = [1, 1, 1]} : vector<2x8x256xf32> to vector<1x8x256xf32>
    %247 = vector.shape_cast %246 : vector<1x8x256xf32> to vector<8x256xf32>
    %248 = arith.addf %241, %247 : vector<8x256xf32>
    %c0_61 = arith.constant 0 : index
    %c0_62 = arith.constant 0 : index
    %c0_63 = arith.constant 0 : index
    %249 = vector.load %arg11[%c0_61, %c0_62, %c0_63] : memref<2x8x256xf32, #tpu.memory_space<vmem>>, vector<1x8x256xf32>
    %250 = vector.shape_cast %249 : vector<1x8x256xf32> to vector<8x256xf32>
    %251 = vector.shape_cast %248 : vector<8x256xf32> to vector<1x8x256xf32>
    tpu.vector_store %arg11[%c0_61, %c0_62, %c0_63], %251 {strides = array<i32>} : memref<2x8x256xf32, #tpu.memory_space<vmem>>, vector<1x8x256xf32>,
    %252 = vector.extract_strided_slice %19 {offsets = [1, 0, 0], sizes = [1, 8, 256], strides = [1, 1, 1]} : vector<2x8x256xf32> to vector<1x8x256xf32>
    %253 = vector.shape_cast %252 : vector<1x8x256xf32> to vector<8x256xf32>
    %254 = arith.addf %245, %253 : vector<8x256xf32>
    %c1 = arith.constant 1 : index
    %c0_64 = arith.constant 0 : index
    %c0_65 = arith.constant 0 : index
    %255 = vector.load %arg11[%c1, %c0_64, %c0_65] : memref<2x8x256xf32, #tpu.memory_space<vmem>>, vector<1x8x256xf32>
    %256 = vector.shape_cast %255 : vector<1x8x256xf32> to vector<8x256xf32>
    %257 = vector.shape_cast %254 : vector<8x256xf32> to vector<1x8x256xf32>
    tpu.vector_store %arg11[%c1, %c0_64, %c0_65], %257 {strides = array<i32>} : memref<2x8x256xf32, #tpu.memory_space<vmem>>, vector<1x8x256xf32>,
    return
  }
}

</mosaic_0001>

<bundles_post_ra>
// kernel: tpu_custom_call.1
= control target key start
LH: loop header
LB: loop body
LE: loop exit
PB: predicated region body
PF: predicated region fallthrough
CT: control target
= control target key end

     0   :  { %vm52_vm0 = vcmask 64512   ;;  %v1271_v5 = vmov 0.0   ;;  %s2223_s0 = inlined_call_operand.vmem [shape: f32[2,8,256], index: 0, kind: input, shape index: {}]   ;;  %s2224_s1 = inlined_call_operand.vmem [shape: f32[9,256], index: 1, kind: input, shape index: {}]   ;;  %s2225_s2 = inlined_call_operand.vmem [shape: f32[16,8], index: 2, kind: input, shape index: {}]   ;;  %s2226_s3 = inlined_call_operand.vmem [shape: f32[16,1], index: 3, kind: input, shape index: {}]   ;;  %s2227_s4 = inlined_call_operand.vmem [shape: f32[16,1], index: 4, kind: input, shape index: {}]   ;;  %s2228_s5 = inlined_call_operand.vmem [shape: f32[16,9], index: 5, kind: input, shape index: {}]   ;;  %s2229_s6 = inlined_call_operand.vmem [shape: f32[16,1], index: 6, kind: input, shape index: {}]   ;;  %s2230_s7 = inlined_call_operand.vmem [shape: f32[16,1], index: 7, kind: input, shape index: {}]   ;;  %s2231_s8 = inlined_call_operand.vmem [shape: f32[8,16], index: 8, kind: input, shape index: {}]   ;;  %s2232_s9 = inlined_call_operand.vmem [shape: f32[8,1], index: 9, kind: input, shape index: {}]   ;;  %s2233_s10 = inlined_call_operand.vmem [shape: f32[8,1], index: 10, kind: input, shape index: {}]   ;;  %s2234_s11 = inlined_call_operand.hbm [shape: f32[2,8,256], index: 11, kind: output, shape index: {}]  }
   0x1   :  { %v46_v0 = vld [vmem:[%s2223_s0 + $0x8] sm:$0xff]  ;;  %v48_v1 = vld [vmem:[%s2223_s0 + $0x18] sm:$0xff]  ;;  %v45_v2 = vld [vmem:[%s2223_s0] sm:$0xff]  ;;  %123 = vmatprep.mubr.f32.mxu0 %v1271_v5 }
   0x2   :  { %59 = vmatprep.subr.mxu0 %v46_v0  ;;  %136 = vmatprep.subr.mxu1 %v48_v1  ;;  %v47_v3 = vld [vmem:[%s2223_s0 + $0x10] sm:$0xff]  ;;  %v49_v4 = vld [vmem:[%s2225_s2] sm:$0xff] }
   0x3   :  { %60 = vmatpush1.msra.mxu0 %v45_v2 }
   0x4   :  { %16 = vsyncpa [#allocation3], 0  ;;  %137 = vmatpush1.msra.mxu1 %v47_v3  ;;  %200 = vmatprep.mubr.f32.mxu1 %v1271_v5  ;;  %v1371_v6 = vld [vmem:[%s2228_s5] sm:$0xff]  ;;  %v50_v7 = vld [vmem:[%s2225_s2 + $0x8] sm:$0xff]  ;;  %v1272_v8 = vmov 0   ;;  %v1273_v10 = vmov 1  }
   0x5   :  { %1180 = vmatmul.mubr.msk.f32.vlgmr.msra.gmra.mrb[0].mxu0 %vm52_vm0, %v49_v4  ;;  %1182 = vmatmul.mubr.msk.f32.vlgmr.msra.gmra.mrb[0].mxu1 %vm52_vm0, %v49_v4  ;;  %v1380_v9 = vld [vmem:[%s2228_s5 + $0x8] sm:$0xff]  ;;  %v1274_v11 = vmov 4   ;;  %v1275_v12 = vmov 2   ;;  %v1276_v13 = vmov 3   ;;  %v1277_v38 = vmov 5   ;;  %v213_v62 = vld [vmem:[%s2226_s3] sm:$0xff] }
   0x6   :  { %206 = vmatprep.mubr.f32.mxu1 %v1271_v5  ;;  %129 = vmatprep.mubr.f32.mxu0 %v1271_v5  ;;  %v1278_v39 = vmov 6   ;;  %v1279_v40 = vmov 7   ;;  %v1280_v41 = vmov 8   ;;  %s1283_s20 = smov 15   ;;  %s1284_s21 = smov 1   ;;  %vm961_vm9 = vcmask 130048  }
   0x7   :  { %1216 = vset.pattern.permute.xlu1 %v1272_v8  ;;  %1219 = vset.pattern.permute.xlu0 %v1273_v10  ;;  %s1285_s22 = smov 127   ;;  %s1286_s23 = smov 113  }
   0x8   :  { %347 = vperm.xlu1 %1216, %v1371_v6   ;;  %392 = vperm.xlu0 %1219, %v1380_v9   ;;  %s1287_s24 = smov 112   ;;  %s1288_s25 = smov 111  }
   0x9   :  { %1183 = vmatmul.mubr.msk.f32.gmra.mrb[2].mxu1 %vm52_vm0, %v50_v7  ;;  %1181 = vmatmul.mubr.msk.f32.gmra.mrb[2].mxu0 %vm52_vm0, %v50_v7 }
   0xa   :  { %1029 = vmatprep.mubr.f32.mxu0 %v1271_v5  ;;  %1100 = vmatprep.mubr.f32.mxu1 %v1271_v5 }
   0xc   :  { %351 = vperm.xlu1 %1216, %v1380_v9   ;;  %1221 = vset.pattern.permute.xlu0 %v1276_v13 }
  0x10   :  { %1217 = vset.pattern.permute.xlu1 %v1274_v11 }
  0x11   :  { %319 = vperm.xlu1 %1217, %v1371_v6  }
  0x15   :  { %324 = vperm.xlu1 %1217, %v1380_v9  }
  0x19   :  { %1218 = vset.pattern.permute.xlu1 %v1273_v10 }
  0x1a   :  { %388 = vperm.xlu1 %1218, %v1371_v6  }
  0x1e   :  { %1220 = vset.pattern.permute.xlu1 %v1275_v12 }
  0x1f   :  { %429 = vperm.xlu1 %1220, %v1371_v6  }
  0x23   :  { %433 = vperm.xlu1 %1220, %v1380_v9  }
  0x27   :  { %1222 = vset.pattern.permute.xlu1 %v1276_v13 }
  0x87   :  { %v1444_v42 = vpop.permute.xlu1 %347  ;;  %v1456_v48 = vpop.permute.xlu0 %392 }
  0x88   :  { %2253 = vst [vmem:[#allocation5_spill] sm:$0xff] %v1456_v48 }
  0x8b   :  { %v1446_v43 = vpop.permute.xlu1 %351 }
  0x90   :  { %v1448_v44 = vpop.permute.xlu1 %319 }
  0x94   :  { %v1450_v45 = vpop.permute.xlu1 %324 }
  0x99   :  { %v1452_v46 = vpop.permute.xlu1 %388 }
  0x9e   :  { %v1454_v47 = vpop.permute.xlu1 %429 }
  0xa2   :  { %v1458_v49 = vpop.permute.xlu1 %433 }
  0xa3   :  { %2254 = vst [vmem:[#allocation6_spill] sm:$0xff] %v1458_v49 }
  0xd8   :  { %v1392_v14 = vpop.f32.mrb[0].mxu0  ;;  %v1394_v15 = vpop.f32.mrb[0].mxu1 }
  0xd9   :  { %v1396_v16 = vpop.f32.mrb[1].mxu0  ;;  %v1398_v17 = vpop.f32.mrb[1].mxu1  ;;  %v223_v18 = vmul.f32 %v1392_v14, %v1392_v14  ;;  %v241_v19 = vmul.f32 %v1394_v15, %v1394_v15 }
  0xda   :  { %v217_v20 = vadd.f32 %v1396_v16, %v1392_v14  ;;  %v233_v21 = vadd.f32 %v1398_v17, %v1394_v15  ;;  %v224_v22 = vmul.f32 %v1396_v16, %v1396_v16  ;;  %v242_v23 = vmul.f32 %v1398_v17, %v1398_v17 }
  0xdc   :  { %218 = vadd.xlane.f32.xlu0 %v217_v20  ;;  %234 = vadd.xlane.f32.xlu1 %v233_v21  ;;  %v227_v24 = vadd.f32 %v224_v22, %v223_v18  ;;  %v245_v25 = vadd.f32 %v242_v23, %v241_v19  ;;  %v1412_v26 = vpop.f32.mrb[2].mxu1  ;;  %v1414_v27 = vpop.f32.mrb[2].mxu0  ;;  %v214_v22 = vld [vmem:[%s2226_s3 + $0x8] sm:$0xff]  ;;  %s1281_s3 = smov 17  }
  0xdd   :  { %v1416_v28 = vpop.f32.mrb[3].mxu1  ;;  %v1418_v29 = vpop.f32.mrb[3].mxu0  ;;  %v225_v30 = vmul.f32 %v1414_v27, %v1414_v27  ;;  %v243_v31 = vmul.f32 %v1412_v26, %v1412_v26 }
  0xde   :  { %v220_v32 = vadd.f32 %v1418_v29, %v1414_v27  ;;  %v236_v33 = vadd.f32 %v1416_v28, %v1412_v26  ;;  %v226_v34 = vmul.f32 %v1418_v29, %v1418_v29  ;;  %v244_v35 = vmul.f32 %v1416_v28, %v1416_v28 }
  0xe0   :  { %228 = vadd.xlane.f32.xlu0 %v227_v24  ;;  %v230_v36 = vadd.f32 %v226_v34, %v225_v30  ;;  %v248_v37 = vadd.f32 %v244_v35, %v243_v31 }
  0xe4   :  { %246 = vadd.xlane.f32.xlu0 %v245_v25  ;;  %v215_v25 = vld [vmem:[%s2227_s4] sm:$0xff] }
  0xe8   :  { %221 = vadd.xlane.f32.xlu0 %v220_v32  ;;  %v216_v32 = vld [vmem:[%s2227_s4 + $0x8] sm:$0xff]  ;;  %s1282_s4 = smov 16  }
  0xed   :  { %474 = vperm.xlu1 %1222, %v1380_v9  }
  0xf1   :  { %1223 = vset.pattern.permute.xlu1 %v1277_v38 }
  0xf2   :  { %511 = vperm.xlu1 %1223, %v1371_v6  }
  0xf6   :  { %1226 = vset.pattern.permute.xlu1 %v1278_v39 }
  0xf7   :  { %556 = vperm.xlu1 %1226, %v1380_v9  }
  0xfb   :  { %1227 = vset.pattern.permute.xlu1 %v1279_v40 }
  0xfc   :  { %593 = vperm.xlu1 %1227, %v1371_v6  }
  0xfe   :  { %470 = vperm.xlu0 %1221, %v1371_v6  }
 0x100   :  { %1230 = vset.pattern.permute.xlu1 %v1280_v41 }
 0x102   :  { %1224 = vset.pattern.permute.xlu0 %v1277_v38 }
 0x103   :  { %515 = vperm.xlu0 %1224, %v1380_v9  }
 0x107   :  { %1225 = vset.pattern.permute.xlu0 %v1278_v39 }
 0x108   :  { %552 = vperm.xlu0 %1225, %v1371_v6  }
 0x10c   :  { %1228 = vset.pattern.permute.xlu0 %v1279_v40 }
 0x10d   :  { %597 = vperm.xlu0 %1228, %v1380_v9  }
 0x111   :  { %1229 = vset.pattern.permute.xlu0 %v1280_v41 }
 0x112   :  { %634 = vperm.xlu0 %1229, %v1371_v6  }
 0x116   :  { %1231 = vset.pattern.permute.xlu0 %v1272_v8 }
 0x120   :  { %237 = vadd.xlane.f32.xlu1 %v236_v33 }
 0x124   :  { %231 = vadd.xlane.f32.xlu1 %v230_v36 }
 0x128   :  { %249 = vadd.xlane.f32.xlu1 %v248_v37 }
 0x139   :  { %638 = vperm.xlu1 %1230, %v1380_v9  }
 0x13d   :  { %1232 = vset.pattern.permute.xlu1 %v1272_v8 }
 0x169   :  { %v219_v50 = vpop.xlane.xlu0 %218  ;;  %v235_v51 = vpop.xlane.xlu1 %234 }
 0x16a   :  { %v239_v52 = vadd.f32 %v235_v51, %v219_v50 }
 0x16c   :  { %v253_v54 = vmul.f32 0.001953125, %v239_v52 }
 0x16d   :  { %v229_v53 = vpop.xlane.xlu0 %228  ;;  %v1463_v2 = vpop.permute.xlu1 %474 }
 0x16e   :  { %v257_v57 = vmul.f32 %v253_v54, %v253_v54  ;;  %2255 = vst [vmem:[#allocation7_spill] sm:$0xff] %v1463_v2 }
 0x171   :  { %v247_v55 = vpop.xlane.xlu0 %246  ;;  %v1465_v3 = vpop.permute.xlu1 %511 }
 0x172   :  { %v251_v56 = vadd.f32 %v247_v55, %v229_v53 }
 0x174   :  { %v255_v58 = vmul.f32 0.001953125, %v251_v56 }
 0x175   :  { %v222_v6 = vpop.xlane.xlu0 %221 }
 0x176   :  { %v259_v59 = vsub.f32 %v255_v58, %v257_v57  ;;  %v1467_v4 = vpop.permute.xlu1 %556 }
 0x177   :  { %2256 = vst [vmem:[#allocation8_spill] sm:$0xff] %v1467_v4 }
 0x178   :  { %v261_v60 = vmax.f32 %v259_v59, 0.0 }
 0x17a   :  { %v263_v61 = vadd.f32 1e-05, %v261_v60 }
 0x17b   :  { %v1469_v5 = vpop.permute.xlu1 %593 }
 0x17c   :  { %1233 = vrsqrt.f32 %v263_v61 }
 0x17d   :  { %v1480_v34 = vpop.permute.xlu0 %470 }
 0x182   :  { %v1482_v35 = vpop.permute.xlu0 %515 }
 0x183   :  { %2257 = vst [vmem:[#allocation9_spill] sm:$0xff] %v1482_v35 }
 0x186   :  { %v1234_v63 = vpop.eup %1233 }
 0x187   :  { %v267_v0 = vmul.f32 %v1234_v63, %v213_v62  ;;  %v1484_v36 = vpop.permute.xlu0 %552 }
 0x189   :  { %275 = vperm.xlu0 %1231, %v267_v0   ;;  %v269_v1 = vmul.f32 %v267_v0, %v253_v54 }
 0x18b   :  { %v271_v30 = vsub.f32 %v215_v25, %v269_v1  ;;  %v1646_v25 = vld [vmem:[%s2224_s1 + $0x8] sm:$0xff] }
 0x18c   :  { %v1486_v37 = vpop.permute.xlu0 %597 }
 0x18d   :  { %2258 = vst [vmem:[#allocation10_spill] sm:$0xff] %v1486_v37 }
 0x191   :  { %v1488_v38 = vpop.permute.xlu0 %634 }
 0x192   :  { %2259 = vst [vmem:[#allocation11_spill] sm:$0xff] %v1488_v38 }
 0x1ad   :  { %v238_v7 = vpop.xlane.xlu1 %237 }
 0x1ae   :  { %v240_v8 = vadd.f32 %v238_v7, %v222_v6 }
 0x1b0   :  { %v254_v10 = vmul.f32 0.001953125, %v240_v8 }
 0x1b1   :  { %v232_v9 = vpop.xlane.xlu1 %231 }
 0x1b2   :  { %v258_v13 = vmul.f32 %v254_v10, %v254_v10 }
 0x1b5   :  { %v250_v11 = vpop.xlane.xlu1 %249 }
 0x1b6   :  { %v252_v12 = vadd.f32 %v250_v11, %v232_v9 }
 0x1b8   :  { %v256_v18 = vmul.f32 0.001953125, %v252_v12 }
 0x1b9   :  { %v1490_v39 = vpop.permute.xlu1 %638 }
 0x1ba   :  { %v260_v19 = vsub.f32 %v256_v18, %v258_v13  ;;  %2260 = vst [vmem:[#allocation12_spill] sm:$0xff] %v1490_v39 }
 0x1bc   :  { %v262_v20 = vmax.f32 %v260_v19, 0.0 }
 0x1be   :  { %v264_v21 = vadd.f32 1e-05, %v262_v20 }
 0x1c0   :  { %1235 = vrsqrt.f32 %v264_v21 }
 0x1ca   :  { %v1236_v23 = vpop.eup %1235 }
 0x1cb   :  { %v268_v24 = vmul.f32 %v1236_v23, %v214_v22 }
 0x1cd   :  { %280 = vperm.xlu1 %1232, %v268_v24   ;;  %v270_v31 = vmul.f32 %v268_v24, %v254_v10  ;;  %v1641_v24 = vld [vmem:[%s2224_s1] sm:$0xff] }
 0x1cf   :  { %v272_v33 = vsub.f32 %v216_v32, %v270_v31 }
 0x1d1   :  { %289 = vperm.xlu1 %1232, %v271_v30  }
 0x1d5   :  { %294 = vperm.xlu1 %1232, %v272_v33  }
 0x208   :  { %v276_v40 = vpop.permute.xlu0 %275 }
 0x209   :  { %v283_v50 = vmul.f32 %v276_v40, %v1392_v14  ;;  %v305_v51 = vmul.f32 %v276_v40, %v1394_v15  ;;  %v284_v53 = vmul.f32 %v276_v40, %v1396_v16  ;;  %v306_v56 = vmul.f32 %v276_v40, %v1398_v17 }
 0x24c   :  { %v281_v41 = vpop.permute.xlu1 %280 }
 0x24d   :  { %v307_v17 = vmul.f32 %v281_v41, %v1412_v26  ;;  %v308_v62 = vmul.f32 %v281_v41, %v1416_v28  ;;  %v285_v26 = vmul.f32 %v281_v41, %v1414_v27  ;;  %v286_v28 = vmul.f32 %v281_v41, %v1418_v29 }
 0x24e   :  { %v339_v29 = vlaneseq }
 0x250   :  { %v290_v52 = vpop.permute.xlu1 %289  ;;  %v1616_v9 = vand.u32 127, %v339_v29  ;;  %v1627_v13 = vshrl.u32 %v339_v29, 7 }
 0x251   :  { %v297_v54 = vadd.f32 %v290_v52, %v283_v50  ;;  %v309_v55 = vadd.f32 %v305_v51, %v290_v52  ;;  %v298_v57 = vadd.f32 %v290_v52, %v284_v53  ;;  %v310_v60 = vadd.f32 %v306_v56, %v290_v52 }
 0x252   :  { %vm341_vm1 = vcmp.lt.s32.totalorder %v1616_v9, 17  ;;  %v360_v22 = vsub.s32 0, %v1627_v13  ;;  %v401_v50 = vsub.s32 1, %v1627_v13  ;;  %vm382_vm2 = vcmp.lt.s32.totalorder %v1616_v9, 16 }
 0x253   :  { %v1496_v58 = vmax.f32 %v297_v54, 0.0  ;;  %v1498_v59 = vmax.f32 %v309_v55, 0.0  ;;  %v1504_v14 = vmax.f32 %v298_v57, 0.0  ;;  %v1506_v15 = vmax.f32 %v310_v60, 0.0 }
 0x254   :  { %v295_v16 = vpop.permute.xlu1 %294  ;;  %v1653_v31 = vrot.slane %v1641_v24, %v360_v22  ;;  %v1656_v32 = vrot.slane %v1646_v25, %v360_v22  ;;  %v442_v29 = vsub.s32 2, %v1627_v13  ;;  %vm423_vm3 = vcmp.lt.s32.totalorder %v1616_v9, 15 }
 0x255   :  { %331 = vrot.lane.b32.xlu0 %v1496_v58, %s1281_s3  ;;  %665 = vrot.lane.b32.xlu1 %v1498_v59, %s1281_s3  ;;  %v311_v61 = vadd.f32 %v307_v17, %v295_v16  ;;  %v312_v63 = vadd.f32 %v308_v62, %v295_v16  ;;  %v299_v1 = vadd.f32 %v295_v16, %v285_v26  ;;  %vm464_vm4 = vcmp.lt.s32.totalorder %v1616_v9, 1 }
 0x256   :  { %v300_v7 = vadd.f32 %v295_v16, %v286_v28  ;;  %v661_v55 = vmul.f32 %v1448_v44, %v1498_v59  ;;  %v662_v56 = vmul.f32 %v1448_v44, %v1506_v15  ;;  %v1679_v16 = vrot.slane %v1641_v24, %v401_v50 }
 0x257   :  { %v1538_v0 = vmax.f32 %v311_v61, 0.0  ;;  %v1545_v6 = vmax.f32 %v312_v63, 0.0  ;;  %v1552_v8 = vmax.f32 %v299_v1, 0.0  ;;  %v1682_v17 = vrot.slane %v1646_v25, %v401_v50 }
 0x258   :  { %v1558_v27 = vmax.f32 %v300_v7, 0.0  ;;  %v1699_v22 = vrot.slane %v1641_v24, %v442_v29  ;;  %vm505_vm5 = vcmp.lt.s32.totalorder %v1616_v9, 127  ;;  %vm546_vm6 = vcmp.lt.s32.totalorder %v1616_v9, 113 }
 0x259   :  { %335 = vrot.lane.b32.xlu0 %v1504_v14, %s1281_s3  ;;  %669 = vrot.lane.b32.xlu1 %v1506_v15, %s1281_s3  ;;  %2261 = vst [vmem:[#allocation13_spill] sm:$0xff] %v1552_v8  ;;  %vm587_vm7 = vcmp.lt.s32.totalorder %v1616_v9, 112  ;;  %vm628_vm8 = vcmp.lt.s32.totalorder %v1616_v9, 111 }
 0x25a   :  { %2262 = vst [vmem:[#allocation14_spill] sm:$0xff] %v1558_v27 }
 0x25d   :  { %693 = vrot.lane.b32.xlu0 %v1506_v15, %s1282_s4  ;;  %374 = vrot.lane.b32.xlu1 %v1496_v58, %s1282_s4 }
 0x261   :  { %415 = vrot.lane.b32.xlu0 %v1496_v58, %s1283_s20  ;;  %378 = vrot.lane.b32.xlu1 %v1504_v14, %s1282_s4 }
 0x265   :  { %419 = vrot.lane.b32.xlu0 %v1504_v14, %s1283_s20  ;;  %689 = vrot.lane.b32.xlu1 %v1498_v59, %s1282_s4 }
 0x269   :  { %741 = vrot.lane.b32.xlu0 %v1506_v15, %s1284_s21  ;;  %713 = vrot.lane.b32.xlu1 %v1498_v59, %s1283_s20 }
 0x26d   :  { %497 = vrot.lane.b32.xlu0 %v1496_v58, %s1285_s22  ;;  %717 = vrot.lane.b32.xlu1 %v1506_v15, %s1283_s20 }
 0x271   :  { %501 = vrot.lane.b32.xlu0 %v1504_v14, %s1285_s22  ;;  %456 = vrot.lane.b32.xlu1 %v1496_v58, %s1284_s21 }
 0x275   :  { %667 = vrot.lane.b32.xlu0 %v1538_v0, %s1281_s3  ;;  %460 = vrot.lane.b32.xlu1 %v1504_v14, %s1284_s21 }
 0x279   :  { %671 = vrot.lane.b32.xlu0 %v1545_v6, %s1281_s3  ;;  %737 = vrot.lane.b32.xlu1 %v1498_v59, %s1284_s21 }
 0x27d   :  { %376 = vrot.lane.b32.xlu0 %v1552_v8, %s1282_s4  ;;  %761 = vrot.lane.b32.xlu1 %v1498_v59, %s1285_s22 }
 0x281   :  { %380 = vrot.lane.b32.xlu0 %v1558_v27, %s1282_s4  ;;  %765 = vrot.lane.b32.xlu1 %v1506_v15, %s1285_s22 }
 0x285   :  { %715 = vrot.lane.b32.xlu0 %v1538_v0, %s1283_s20  ;;  %538 = vrot.lane.b32.xlu1 %v1496_v58, %s1286_s23 }
 0x289   :  { %719 = vrot.lane.b32.xlu0 %v1545_v6, %s1283_s20  ;;  %542 = vrot.lane.b32.xlu1 %v1504_v14, %s1286_s23 }
 0x28d   :  { %458 = vrot.lane.b32.xlu0 %v1552_v8, %s1284_s21  ;;  %785 = vrot.lane.b32.xlu1 %v1498_v59, %s1286_s23 }
 0x291   :  { %462 = vrot.lane.b32.xlu0 %v1558_v27, %s1284_s21  ;;  %789 = vrot.lane.b32.xlu1 %v1506_v15, %s1286_s23 }
 0x295   :  { %763 = vrot.lane.b32.xlu0 %v1538_v0, %s1285_s22  ;;  %579 = vrot.lane.b32.xlu1 %v1496_v58, %s1287_s24 }
 0x299   :  { %767 = vrot.lane.b32.xlu0 %v1545_v6, %s1285_s22  ;;  %583 = vrot.lane.b32.xlu1 %v1504_v14, %s1287_s24 }
 0x29d   :  { %540 = vrot.lane.b32.xlu0 %v1552_v8, %s1286_s23  ;;  %809 = vrot.lane.b32.xlu1 %v1498_v59, %s1287_s24 }
 0x2a1   :  { %544 = vrot.lane.b32.xlu0 %v1558_v27, %s1286_s23  ;;  %813 = vrot.lane.b32.xlu1 %v1506_v15, %s1287_s24 }
 0x2a5   :  { %787 = vrot.lane.b32.xlu0 %v1538_v0, %s1286_s23  ;;  %620 = vrot.lane.b32.xlu1 %v1496_v58, %s1288_s25 }
 0x2a9   :  { %791 = vrot.lane.b32.xlu0 %v1545_v6, %s1286_s23  ;;  %624 = vrot.lane.b32.xlu1 %v1504_v14, %s1288_s25 }
 0x2ad   :  { %581 = vrot.lane.b32.xlu0 %v1552_v8, %s1287_s24  ;;  %333 = vrot.lane.b32.xlu1 %v1552_v8, %s1281_s3 }
 0x2b1   :  { %585 = vrot.lane.b32.xlu0 %v1558_v27, %s1287_s24  ;;  %337 = vrot.lane.b32.xlu1 %v1558_v27, %s1281_s3 }
 0x2b5   :  { %811 = vrot.lane.b32.xlu0 %v1538_v0, %s1287_s24  ;;  %691 = vrot.lane.b32.xlu1 %v1538_v0, %s1282_s4 }
 0x2b9   :  { %815 = vrot.lane.b32.xlu0 %v1545_v6, %s1287_s24  ;;  %695 = vrot.lane.b32.xlu1 %v1545_v6, %s1282_s4 }
 0x2bd   :  { %622 = vrot.lane.b32.xlu0 %v1552_v8, %s1288_s25  ;;  %417 = vrot.lane.b32.xlu1 %v1552_v8, %s1283_s20 }
 0x2c1   :  { %626 = vrot.lane.b32.xlu0 %v1558_v27, %s1288_s25  ;;  %421 = vrot.lane.b32.xlu1 %v1558_v27, %s1283_s20 }
 0x2c5   :  { %835 = vrot.lane.b32.xlu0 %v1538_v0, %s1288_s25  ;;  %739 = vrot.lane.b32.xlu1 %v1538_v0, %s1284_s21 }
 0x2c7   :  { %v1618_v10 = vpop.permute.xlu0 %331  ;;  %v666_v11 = vpop.permute.xlu1 %665 }
 0x2c9   :  { %839 = vrot.lane.b32.xlu0 %v1545_v6, %s1288_s25  ;;  %743 = vrot.lane.b32.xlu1 %v1545_v6, %s1284_s21 }
 0x2cb   :  { %v1625_v12 = vpop.permute.xlu0 %335  ;;  %v670_v18 = vpop.permute.xlu1 %669 }
 0x2cc   :  { %v673_v19 = vsel %vm341_vm1, %v666_v11, %v670_v18  ;;  %v675_v20 = vsel %vm341_vm1, %v670_v18, %v666_v11 }
 0x2cd   :  { %499 = vrot.lane.b32.xlu1 %v1552_v8, %s1285_s22  ;;  %v677_v33 = vmul.f32 %v675_v20, %v1444_v42  ;;  %v678_v40 = vmul.f32 %v673_v19, %v1444_v42 }
 0x2cf   :  { %v694_v21 = vpop.permute.xlu0 %693  ;;  %v1636_v23 = vpop.permute.xlu1 %374  ;;  %v681_v52 = vmul.f32 %v677_v33, %v1653_v31  ;;  %v682_v53 = vmul.f32 %v678_v40, %v1656_v32  ;;  %v1702_v33 = vrot.slane %v1646_v25, %v442_v29 }
 0x2d1   :  { %503 = vrot.lane.b32.xlu1 %v1558_v27, %s1285_s22  ;;  %v685_v63 = vadd.f32 %v681_v52, %v661_v55  ;;  %v686_v26 = vadd.f32 %v682_v53, %v662_v56  ;;  %s1289_s22 = smov [#allocation2]  }
 0x2d2   :  { %s1169_s23 = sshll.u32 %s1289_s22, 4  ;;  %s1170_s23 = int_to_ptr.vmem [resolvable:$true] %s1169_s23 }
 0x2d3   :  { %v1650_v30 = vpop.permute.xlu0 %415  ;;  %v1660_v41 = vpop.permute.xlu1 %378  ;;  %s1247_s30 = scalar_lea.vmem %s1170_s23, 512  ;;  %p1252_p1 = scmp.lt.s32.totalorder %s1170_s23, %s1170_s23 }
 0x2d4   :  { %v385_v8 = vsel %vm382_vm2, %v1660_v41, %v1636_v23  ;;  %p1248_p0 = scmp.ne.s32.totalorder %s1170_s23, %s1247_s30  ;;  %p1253_p2 = scmp.lt.s32.totalorder %s1247_s30, %s1247_s30 }
 0x2d5   :  { %833 = vrot.lane.b32.xlu1 %v1498_v59, %s1288_s25 }
 0x2d6   :  { %p1254_p3 = por %p1253_p2, %p1252_p1 }
 0x2d7   :  { %v1665_v51 = vpop.permute.xlu0 %419  ;;  %v690_v54 = vpop.permute.xlu1 %689 }
 0x2d8   :  { %v697_v57 = vsel %vm382_vm2, %v690_v54, %v694_v21  ;;  %v699_v60 = vsel %vm382_vm2, %v694_v21, %v690_v54  ;;  %p1255_p4 = pnand %p1254_p3, %p1248_p0 }
 0x2d9   :  { %v701_v61 = vmul.f32 %v699_v60, %v1452_v46  ;;  %v702_v62 = vmul.f32 %v697_v57, %v1452_v46  ;;  %837 = vrot.lane.b32.xlu1 %v1506_v15, %s1288_s25 }
 0x2db   :  { %v742_v59 = vpop.permute.xlu0 %741  ;;  %v705_v1 = vmul.f32 %v701_v61, %v1679_v16  ;;  %v706_v28 = vmul.f32 %v702_v62, %v1682_v17  ;;  %v714_v7 = vpop.permute.xlu1 %713  ;;  %v483_v62 = vsub.s32 3, %v1627_v13 }
 0x2dd   :  { %v709_v11 = vadd.f32 %v705_v1, %v685_v63  ;;  %v710_v18 = vadd.f32 %v706_v28, %v686_v26 }
 0x2df   :  { %v1691_v19 = vpop.permute.xlu0 %497  ;;  %v718_v20 = vpop.permute.xlu1 %717 }
 0x2e0   :  { %v721_v15 = vsel %vm423_vm3, %v714_v7, %v718_v20  ;;  %v723_v21 = vsel %vm423_vm3, %v718_v20, %v714_v7 }
 0x2e1   :  { %v725_v40 = vmul.f32 %v723_v21, %v1454_v47  ;;  %v726_v50 = vmul.f32 %v721_v15, %v1454_v47 }
 0x2e3   :  { %v1706_v52 = vpop.permute.xlu0 %501  ;;  %v729_v53 = vmul.f32 %v725_v40, %v1699_v22  ;;  %v730_v54 = vmul.f32 %v726_v50, %v1702_v33  ;;  %v1710_v55 = vpop.permute.xlu1 %456 }
 0x2e5   :  { %v733_v56 = vadd.f32 %v729_v53, %v709_v11  ;;  %v734_v57 = vadd.f32 %v730_v54, %v710_v18  ;;  %v1729_v11 = vrot.slane %v1641_v24, %v483_v62  ;;  %v1732_v18 = vrot.slane %v1646_v25, %v483_v62 }
 0x2e6   :  { %v524_v54 = vsub.s32 5, %v1627_v13 }
 0x2e7   :  { %v668_v60 = vpop.permute.xlu0 %667  ;;  %v1712_v61 = vpop.permute.xlu1 %460 }
 0x2eb   :  { %v672_v63 = vpop.permute.xlu0 %671  ;;  %v738_v28 = vpop.permute.xlu1 %737 }
 0x2ec   :  { %v1718_v26 = vsel %vm341_vm1, %v668_v60, %v672_v63  ;;  %v1722_v1 = vsel %vm341_vm1, %v672_v63, %v668_v60  ;;  %v745_v7 = vsel %vm464_vm4, %v738_v28, %v742_v59  ;;  %v747_v29 = vsel %vm464_vm4, %v742_v59, %v738_v28 }
 0x2ed   :  { %v749_v20 = vmul.f32 %v747_v29, %v1480_v34  ;;  %v750_v15 = vmul.f32 %v745_v7, %v1480_v34 }
 0x2ef   :  { %v377_v21 = vpop.permute.xlu0 %376  ;;  %v753_v40 = vmul.f32 %v749_v20, %v1729_v11  ;;  %v754_v50 = vmul.f32 %v750_v15, %v1732_v18  ;;  %v762_v53 = vpop.permute.xlu1 %761 }
 0x2f1   :  { %v757_v60 = vadd.f32 %v753_v40, %v733_v56  ;;  %v758_v59 = vadd.f32 %v754_v50, %v734_v57  ;;  %v1753_v56 = vrot.slane %v1641_v24, %v524_v54  ;;  %v1756_v57 = vrot.slane %v1646_v25, %v524_v54 }
 0x2f2   :  { %v565_v54 = vsub.s32 6, %v1627_v13 }
 0x2f3   :  { %v381_v63 = vpop.permute.xlu0 %380  ;;  %v766_v7 = vpop.permute.xlu1 %765 }
 0x2f4   :  { %v1742_v62 = vsel %vm382_vm2, %v377_v21, %v381_v63  ;;  %v1746_v28 = vsel %vm382_vm2, %v381_v63, %v377_v21  ;;  %v769_v29 = vsel %vm505_vm5, %v762_v53, %v766_v7  ;;  %v771_v20 = vsel %vm505_vm5, %v766_v7, %v762_v53 }
 0x2f5   :  { %2263 = vst [vmem:[#allocation15_spill] sm:$0xff] %v1742_v62  ;;  %2264 = vst [vmem:[#allocation16_spill] sm:$0xff] %v1746_v28  ;;  %v773_v15 = vmul.f32 %v769_v29, %v1465_v3  ;;  %v774_v40 = vmul.f32 %v771_v20, %v1465_v3  ;;  %v1773_v20 = vrot.slane %v1641_v24, %v565_v54 }
 0x2f6   :  { %v395_v28 = vmul.f32 %v1452_v46, %v385_v8 }
 0x2f7   :  { %v1760_v50 = vpop.permute.xlu0 %715  ;;  %v777_v21 = vmul.f32 %v773_v15, %v1753_v56  ;;  %v778_v63 = vmul.f32 %v774_v40, %v1756_v57  ;;  %v539_v39 = vpop.permute.xlu1 %538  ;;  %v1776_v15 = vrot.slane %v1646_v25, %v565_v54  ;;  %v344_v40 = vsel %vm341_vm1, %v1625_v12, %v1618_v10 }
 0x2f8   :  { %v383_v54 = vsel %vm382_vm2, %v1636_v23, %v1660_v41  ;;  %v354_v49 = vmul.f32 %v1444_v42, %v344_v40  ;;  %v424_v23 = vsel %vm423_vm3, %v1650_v30, %v1665_v51  ;;  %v426_v41 = vsel %vm423_vm3, %v1665_v51, %v1650_v30 }
 0x2f9   :  { %v781_v37 = vadd.f32 %v777_v21, %v757_v60  ;;  %v782_v4 = vadd.f32 %v778_v63, %v758_v59  ;;  %v342_v59 = vsel %vm341_vm1, %v1618_v10, %v1625_v12  ;;  %v465_v30 = vsel %vm464_vm4, %v1710_v55, %v1712_v61 }
 0x2fa   :  { %v366_v8 = vmul.f32 %v1653_v31, %v354_v49  ;;  %v328_v49 = vmul.f32 %v1448_v44, %v1504_v14  ;;  %v407_v51 = vmul.f32 %v1679_v16, %v395_v28 }
 0x2fb   :  { %v1764_v53 = vpop.permute.xlu0 %719  ;;  %v543_v7 = vpop.permute.xlu1 %542 }
 0x2fc   :  { %v547_v28 = vsel %vm546_vm6, %v539_v39, %v543_v7 }
 0x2ff   :  { %v1766_v35 = vpop.permute.xlu0 %458  ;;  %v786_v27 = vpop.permute.xlu1 %785 }
 0x300   :  { %2265 = vst [vmem:[#allocation17_spill] sm:$0xff] %v1766_v35  ;;  %v396_v35 = vmul.f32 %v1452_v46, %v383_v54 }
 0x303   :  { %v1769_v29 = vpop.permute.xlu0 %462  ;;  %v790_v60 = vpop.permute.xlu1 %789 }
 0x304   :  { %v793_v21 = vsel %vm546_vm6, %v786_v27, %v790_v60  ;;  %v795_v63 = vsel %vm546_vm6, %v790_v60, %v786_v27  ;;  %v355_v27 = vmul.f32 %v1444_v42, %v342_v59 }
 0x305   :  { %v797_v2 = vmul.f32 %v793_v21, %v1484_v36  ;;  %v798_v10 = vmul.f32 %v795_v63, %v1484_v36  ;;  %v436_v21 = vmul.f32 %v1454_v47, %v426_v41  ;;  %v437_v63 = vmul.f32 %v1454_v47, %v424_v23 }
 0x306   :  { %v367_v46 = vmul.f32 %v1656_v32, %v355_v27  ;;  %v408_v47 = vmul.f32 %v1682_v17, %v396_v35  ;;  %v606_v35 = vsub.s32 7, %v1627_v13  ;;  %v549_v41 = vsel %vm546_vm6, %v543_v7, %v539_v39 }
 0x307   :  { %v1800_v12 = vpop.permute.xlu0 %763  ;;  %v801_v60 = vmul.f32 %v797_v2, %v1773_v20  ;;  %v802_v62 = vmul.f32 %v798_v10, %v1776_v15  ;;  %v580_v48 = vpop.permute.xlu1 %579  ;;  %v449_v14 = vmul.f32 %v1702_v33, %v437_v63  ;;  %v559_v7 = vmul.f32 %v1484_v36, %v547_v28 }
 0x308   :  { %v371_v10 = vadd.f32 %v367_v46, %v328_v49  ;;  %v560_v49 = vmul.f32 %v1484_v36, %v549_v41 }
 0x309   :  { %v1816_v42 = vadd.f32 %v801_v60, %v781_v37  ;;  %v1818_v2 = vadd.f32 %v802_v62, %v782_v4  ;;  %v467_v4 = vsel %vm464_vm4, %v1712_v61, %v1710_v55  ;;  %v327_v37 = vmul.f32 %v1448_v44, %v1496_v58 }
 0x30a   :  { %v477_v27 = vmul.f32 %v1480_v34, %v467_v4  ;;  %v478_v60 = vmul.f32 %v1480_v34, %v465_v30  ;;  %v448_v55 = vmul.f32 %v1699_v22, %v436_v21  ;;  %v412_v44 = vadd.f32 %v408_v47, %v371_v10 }
 0x30b   :  { %2266 = vst [vmem:[#allocation18_spill] sm:$0xff] %v1816_v42  ;;  %2267 = vst [vmem:[#allocation19_spill] sm:$0xff] %v1818_v2  ;;  %v1820_v59 = vpop.permute.xlu0 %767  ;;  %v584_v40 = vpop.permute.xlu1 %583  ;;  %v370_v54 = vadd.f32 %v366_v8, %v327_v37  ;;  %v506_v58 = vsel %vm505_vm5, %v1691_v19, %v1706_v52  ;;  %v508_v34 = vsel %vm505_vm5, %v1706_v52, %v1691_v19 }
 0x30c   :  { %v489_v13 = vmul.f32 %v1729_v11, %v477_v27  ;;  %v490_v46 = vmul.f32 %v1732_v18, %v478_v60  ;;  %v453_v30 = vadd.f32 %v449_v14, %v412_v44  ;;  %v588_v4 = vsel %vm587_vm7, %v580_v48, %v584_v40 }
 0x30d   :  { %v411_v61 = vadd.f32 %v407_v51, %v370_v54  ;;  %v590_v19 = vsel %vm587_vm7, %v584_v40, %v580_v48  ;;  %v518_v52 = vmul.f32 %v1465_v3, %v506_v58  ;;  %v519_v39 = vmul.f32 %v1465_v3, %v508_v34  ;;  %v1898_v58 = vld [vmem:[%s2224_s1 + $0x10] ss:$0 sm:$0xff]  ;;  %v1903_v34 = vld [vmem:[%s2224_s1 + $0x18] ss:$0 sm:$0xff] }
 0x30e   :  { %v1877_v37 = vrot.slane %v1641_v24, %v606_v35  ;;  %v1880_v51 = vrot.slane %v1646_v25, %v606_v35  ;;  %v494_v10 = vadd.f32 %v490_v46, %v453_v30  ;;  %v600_v48 = vmul.f32 %v1469_v5, %v588_v4  ;;  %2268 = vst [vmem:[#allocation20_spill] sm:$0xff] %v1903_v34 }
 0x30f   :  { %v1840_v62 = vpop.permute.xlu0 %540  ;;  %v1844_v23 = vpop.permute.xlu1 %809  ;;  %v452_v63 = vadd.f32 %v448_v55, %v411_v61  ;;  %v601_v40 = vmul.f32 %v1469_v5, %v590_v19  ;;  %v530_v3 = vmul.f32 %v1753_v56, %v518_v52  ;;  %v531_v36 = vmul.f32 %v1756_v57, %v519_v39 }
 0x310   :  { %v571_v24 = vmul.f32 %v1773_v20, %v559_v7  ;;  %v572_v25 = vmul.f32 %v1776_v15, %v560_v49  ;;  %v612_v61 = vmul.f32 %v1877_v37, %v600_v48 }
 0x311   :  { %v493_v54 = vadd.f32 %v489_v13, %v452_v63  ;;  %v535_v14 = vadd.f32 %v531_v36, %v494_v10  ;;  %v613_v44 = vmul.f32 %v1880_v51, %v601_v40 }
 0x313   :  { %v1862_v8 = vpop.permute.xlu0 %544  ;;  %v1866_v21 = vpop.permute.xlu1 %813  ;;  %v534_v55 = vadd.f32 %v530_v3, %v493_v54  ;;  %v576_v46 = vadd.f32 %v572_v25, %v535_v14  ;;  %v680_v25 = vmul.f32 %v1718_v26, %v1446_v43 }
 0x315   :  { %v575_v13 = vadd.f32 %v571_v24, %v534_v55  ;;  %v617_v52 = vadd.f32 %v613_v44, %v576_v46  ;;  %v679_v24 = vmul.f32 %v1722_v1, %v1446_v43  ;;  %v663_v44 = vmul.f32 %v1450_v45, %v1538_v0  ;;  %v2273_v46 = vld [vmem:[#allocation5_spill] sm:$0xff] }
 0x316   :  { %v724_v1 = vsel %vm423_vm3, %v1764_v53, %v1760_v50 }
 0x317   :  { %v1882_v47 = vpop.permute.xlu0 %787  ;;  %v621_v27 = vpop.permute.xlu1 %620  ;;  %v616_v19 = vadd.f32 %v612_v61, %v575_v13  ;;  %v664_v61 = vmul.f32 %v1450_v45, %v1545_v6  ;;  %v683_v26 = vmul.f32 %v679_v24, %v1653_v31  ;;  %v2272_v13 = vld [vmem:[#allocation16_spill] sm:$0xff] }
 0x31b   :  { %v1891_v60 = vpop.permute.xlu0 %791  ;;  %v625_v35 = vpop.permute.xlu1 %624 }
 0x31c   :  { %v629_v28 = vsel %vm628_vm8, %v621_v27, %v625_v35  ;;  %v631_v41 = vsel %vm628_vm8, %v625_v35, %v621_v27  ;;  %v722_v35 = vsel %vm423_vm3, %v1760_v50, %v1764_v53  ;;  %v770_v53 = vsel %vm505_vm5, %v1800_v12, %v1820_v59 }
 0x31d   :  { %v641_v63 = vmul.f32 %v1488_v38, %v629_v28  ;;  %v642_v30 = vmul.f32 %v1488_v38, %v631_v41  ;;  %v684_v28 = vmul.f32 %v680_v25, %v1656_v32  ;;  %v2271_v41 = vld [vmem:[#allocation17_spill] sm:$0xff] }
 0x31e   :  { %v466_v6 = vsel %vm464_vm4, %v2271_v41, %v1769_v29  ;;  %v468_v0 = vsel %vm464_vm4, %v1769_v29, %v2271_v41  ;;  %v2276_v41 = vld [vmem:[#allocation7_spill] sm:$0xff] }
 0x31f   :  { %v1911_v4 = vpop.permute.xlu0 %581  ;;  %v653_v39 = vmul.f32 %v1898_v58, %v641_v63  ;;  %v654_v7 = vmul.f32 %v1903_v34, %v642_v30  ;;  %v334_v49 = vpop.permute.xlu1 %333  ;;  %v397_v63 = vmul.f32 %v2273_v46, %v2272_v13  ;;  %v2274_v30 = vld [vmem:[#allocation15_spill] sm:$0xff]  ;;  %v479_v13 = vmul.f32 %v2276_v41, %v468_v0 }
 0x320   :  { %v398_v50 = vmul.f32 %v2273_v46, %v2274_v30  ;;  %v480_v30 = vmul.f32 %v2276_v41, %v466_v6  ;;  %v688_v0 = vadd.f32 %v684_v28, %v664_v61 }
 0x321   :  { %v1915_v54 = vadd.f32 %v653_v39, %v616_v19  ;;  %v1917_v10 = vadd.f32 %v654_v7, %v617_v52  ;;  %v772_v19 = vsel %vm505_vm5, %v1820_v59, %v1800_v12  ;;  %v2275_v39 = vld [vmem:[#allocation6_spill] sm:$0xff] }
 0x322   :  { %v727_v29 = vmul.f32 %v724_v1, %v2275_v39  ;;  %v728_v7 = vmul.f32 %v722_v35, %v2275_v39  ;;  %v2278_v59 = vld [vmem:[#allocation14_spill] sm:$0xff]  ;;  %v2279_v1 = vld [vmem:[#allocation9_spill] sm:$0xff]  ;;  %v2007_v28 = vmul.f32 %v1732_v18, %v480_v30 }
 0x323   :  { %2269 = vst [vmem:[#allocation21_spill] sm:$0xff] %v1915_v54  ;;  %2270 = vst [vmem:[#allocation22_spill] sm:$0xff] %v1917_v10  ;;  %v1919_v48 = vpop.permute.xlu0 %585  ;;  %v338_v40 = vpop.permute.xlu1 %337  ;;  %v861_v27 = vadd.f32 %v1917_v10, %v1915_v54  ;;  %v2277_v10 = vld [vmem:[#allocation13_spill] sm:$0xff]  ;;  %v330_v54 = vmul.f32 %v1450_v45, %v2278_v59  ;;  %v775_v2 = vmul.f32 %v770_v53, %v2279_v1 }
 0x324   :  { %v329_v12 = vmul.f32 %v1450_v45, %v2277_v10  ;;  %v776_v35 = vmul.f32 %v772_v19, %v2279_v1  ;;  %v343_v42 = vsel %vm341_vm1, %v334_v49, %v338_v40  ;;  %v409_v45 = vmul.f32 %v1679_v16, %v397_v63 }
 0x325   :  { %862 = vadd.xlane.f32.xlu1 %v861_v27  ;;  %v410_v53 = vmul.f32 %v1682_v17, %v398_v50  ;;  %v731_v19 = vmul.f32 %v727_v29, %v1699_v22  ;;  %v732_v59 = vmul.f32 %v728_v7, %v1702_v33  ;;  %v817_v50 = vsel %vm587_vm7, %v1844_v23, %v1866_v21  ;;  %v2280_v29 = vld [vmem:[#allocation8_spill] sm:$0xff] }
 0x326   :  { %v780_v63 = vmul.f32 %v776_v35, %v1756_v57 }
 0x327   :  { %v1923_v3 = vpop.permute.xlu0 %811  ;;  %v692_v36 = vpop.permute.xlu1 %691 }
 0x32b   :  { %v1929_v55 = vpop.permute.xlu0 %815  ;;  %v696_v14 = vpop.permute.xlu1 %695 }
 0x32c   :  { %v698_v27 = vsel %vm382_vm2, %v692_v36, %v696_v14  ;;  %v700_v24 = vsel %vm382_vm2, %v696_v14, %v692_v36  ;;  %v345_v36 = vsel %vm341_vm1, %v338_v40, %v334_v49  ;;  %v687_v14 = vadd.f32 %v683_v26, %v663_v44 }
 0x32d   :  { %v703_v6 = vmul.f32 %v700_v24, %v2273_v46  ;;  %v704_v38 = vmul.f32 %v698_v27, %v2273_v46  ;;  %v548_v49 = vsel %vm546_vm6, %v1840_v62, %v1862_v8  ;;  %v550_v40 = vsel %vm546_vm6, %v1862_v8, %v1840_v62 }
 0x32e   :  { %v356_v61 = vmul.f32 %v1446_v43, %v345_v36  ;;  %v357_v44 = vmul.f32 %v1446_v43, %v343_v42  ;;  %v2004_v26 = vmul.f32 %v1729_v11, %v479_v13  ;;  %v779_v46 = vmul.f32 %v775_v2, %v1753_v56 }
 0x32f   :  { %v1965_v52 = vpop.permute.xlu0 %622  ;;  %v418_v25 = vpop.permute.xlu1 %417  ;;  %v819_v43 = vsel %vm587_vm7, %v1866_v21, %v1844_v23  ;;  %v707_v42 = vmul.f32 %v703_v6, %v1679_v16  ;;  %v708_v62 = vmul.f32 %v704_v38, %v1682_v17  ;;  %v2022_v7 = vmul.f32 %v2280_v29, %v548_v49 }
 0x330   :  { %v2025_v2 = vmul.f32 %v2280_v29, %v550_v40  ;;  %v794_v16 = vsel %vm546_vm6, %v1882_v47, %v1891_v60  ;;  %v796_v38 = vsel %vm546_vm6, %v1891_v60, %v1882_v47  ;;  %v368_v17 = vmul.f32 %v1653_v31, %v356_v61  ;;  %v2281_v40 = vld [vmem:[#allocation10_spill] sm:$0xff] }
 0x331   :  { %v369_v23 = vmul.f32 %v1656_v32, %v357_v44  ;;  %v2042_v21 = vmul.f32 %v817_v50, %v1469_v5  ;;  %v820_v47 = vsel %vm587_vm7, %v1929_v55, %v1923_v3  ;;  %v711_v60 = vadd.f32 %v707_v42, %v687_v14 }
 0x332   :  { %v712_v31 = vadd.f32 %v708_v62, %v688_v0  ;;  %v799_v35 = vmul.f32 %v794_v16, %v2280_v29  ;;  %v589_v36 = vsel %vm587_vm7, %v1911_v4, %v1919_v48  ;;  %v372_v14 = vadd.f32 %v368_v17, %v329_v12 }
 0x333   :  { %v1987_v10 = vpop.permute.xlu0 %626  ;;  %v422_v34 = vpop.permute.xlu1 %421  ;;  %v373_v0 = vadd.f32 %v369_v23, %v330_v54  ;;  %v824_v44 = vmul.f32 %v820_v47, %v2281_v40  ;;  %v735_v54 = vadd.f32 %v731_v19, %v711_v60 }
 0x334   :  { %v425_v27 = vsel %vm423_vm3, %v418_v25, %v422_v34  ;;  %v427_v24 = vsel %vm423_vm3, %v422_v34, %v418_v25  ;;  %v2045_v34 = vmul.f32 %v819_v43, %v1469_v5  ;;  %v818_v25 = vsel %vm587_vm7, %v1923_v3, %v1929_v55 }
 0x335   :  { %v438_v32 = vmul.f32 %v2275_v39, %v427_v24  ;;  %v439_v30 = vmul.f32 %v2275_v39, %v425_v27  ;;  %v800_v5 = vmul.f32 %v796_v38, %v2280_v29  ;;  %v591_v3 = vsel %vm587_vm7, %v1919_v48, %v1911_v4 }
 0x336   :  { %v823_v61 = vmul.f32 %v818_v25, %v2281_v40  ;;  %v736_v12 = vadd.f32 %v732_v59, %v712_v31  ;;  %v414_v16 = vadd.f32 %v410_v53, %v373_v0  ;;  %v603_v19 = vmul.f32 %v2281_v40, %v591_v3 }
 0x337   :  { %v836_v8 = vpop.permute.xlu0 %835  ;;  %v740_v13 = vpop.permute.xlu1 %739  ;;  %v450_v4 = vmul.f32 %v1699_v22, %v438_v32  ;;  %v451_v48 = vmul.f32 %v1702_v33, %v439_v30  ;;  %v413_v22 = vadd.f32 %v409_v45, %v372_v14  ;;  %v602_v33 = vmul.f32 %v2281_v40, %v589_v36 }
 0x338   :  { %v828_v47 = vmul.f32 %v824_v44, %v1880_v51  ;;  %v630_v53 = vsel %vm628_vm8, %v1965_v52, %v1987_v10  ;;  %v632_v32 = vsel %vm628_vm8, %v1987_v10, %v1965_v52 }
 0x339   :  { %v454_v17 = vadd.f32 %v450_v4, %v413_v22  ;;  %v455_v23 = vadd.f32 %v451_v48, %v414_v16  ;;  %v826_v4 = vmul.f32 %v2045_v34, %v1880_v51 }
 0x33b   :  { %v744_v55 = vpop.permute.xlu1 %743  ;;  %v840_v6 = vpop.permute.xlu0 %839  ;;  %v495_v0 = vadd.f32 %v2004_v26, %v454_v17  ;;  %v496_v52 = vadd.f32 %v2007_v28, %v455_v23 }
 0x33c   :  { %v746_v39 = vsel %vm464_vm4, %v740_v13, %v744_v55  ;;  %v748_v49 = vsel %vm464_vm4, %v744_v55, %v740_v13  ;;  %v842_v42 = vsel %vm628_vm8, %v836_v8, %v840_v6  ;;  %v844_v62 = vsel %vm628_vm8, %v840_v6, %v836_v8  ;;  %v2282_v8 = vld [vmem:[#allocation12_spill] sm:$0xff] }
 0x33d   :  { %v751_v50 = vmul.f32 %v748_v49, %v2276_v41  ;;  %v752_v43 = vmul.f32 %v746_v39, %v2276_v41  ;;  %v803_v13 = vmul.f32 %v799_v35, %v1773_v20  ;;  %v804_v41 = vmul.f32 %v800_v5, %v1776_v15  ;;  %v2283_v55 = vld [vmem:[#allocation20_spill] sm:$0xff] }
 0x33e   :  { %v847_v25 = vmul.f32 %v842_v42, %v2282_v8  ;;  %v643_v44 = vmul.f32 %v2282_v8, %v630_v53 }
 0x33f   :  { %v755_v29 = vmul.f32 %v751_v50, %v1729_v11  ;;  %v756_v27 = vmul.f32 %v752_v43, %v1732_v18  ;;  %v500_v24 = vpop.permute.xlu1 %499  ;;  %v848_v11 = vmul.f32 %v844_v62, %v2282_v8  ;;  %v827_v18 = vmul.f32 %v823_v61, %v1877_v37 }
 0x340   :  { %v851_v3 = vmul.f32 %v1898_v58, %v847_v25  ;;  %v573_v61 = vmul.f32 %v1773_v20, %v2022_v7  ;;  %v644_v50 = vmul.f32 %v2282_v8, %v632_v32  ;;  %v614_v20 = vmul.f32 %v1877_v37, %v602_v33  ;;  %v2287_v8 = vld [vmem:[#allocation21_spill] sm:$0xff] }
 0x341   :  { %v759_v59 = vadd.f32 %v755_v29, %v735_v54  ;;  %v760_v38 = vadd.f32 %v756_v27, %v736_v12  ;;  %v852_v14 = vmul.f32 %v2283_v55, %v848_v11  ;;  %v655_v12 = vmul.f32 %v1898_v58, %v643_v44  ;;  %v2284_v29 = vld [vmem:[#allocation11_spill] sm:$0xff] }
 0x342   :  { %v656_v42 = vmul.f32 %v2283_v55, %v644_v50  ;;  %v867_v25 = vmul.f32 %v2287_v8, %v2287_v8 }
 0x343   :  { %v783_v60 = vadd.f32 %v779_v46, %v759_v59  ;;  %v784_v31 = vadd.f32 %v780_v63, %v760_v38  ;;  %v504_v45 = vpop.permute.xlu1 %503 }
 0x344   :  { %v507_v30 = vsel %vm505_vm5, %v500_v24, %v504_v45  ;;  %v509_v35 = vsel %vm505_vm5, %v504_v45, %v500_v24  ;;  %v2285_v24 = vld [vmem:[#allocation18_spill] sm:$0xff] }
 0x345   :  { %v807_v5 = vadd.f32 %v803_v13, %v783_v60  ;;  %v808_v46 = vadd.f32 %v804_v41, %v784_v31  ;;  %v520_v63 = vmul.f32 %v2279_v1, %v507_v30  ;;  %v521_v36 = vmul.f32 %v2279_v1, %v509_v35  ;;  %v2286_v41 = vld [vmem:[#allocation19_spill] sm:$0xff] }
 0x346   :  { %v574_v1 = vmul.f32 %v1776_v15, %v2025_v2  ;;  %v615_v15 = vmul.f32 %v1880_v51, %v603_v19  ;;  %v830_v22 = vadd.f32 %v826_v4, %v2286_v41 }
 0x347   :  { %v532_v10 = vmul.f32 %v1753_v56, %v520_v63  ;;  %v533_v6 = vmul.f32 %v1756_v57, %v521_v36  ;;  %v834_v39 = vpop.permute.xlu1 %833  ;;  %v831_v49 = vadd.f32 %v827_v18, %v807_v5  ;;  %v832_v40 = vadd.f32 %v828_v47, %v808_v46 }
 0x348   :  { %v825_v57 = vmul.f32 %v2042_v21, %v1877_v37 }
 0x349   :  { %v536_v26 = vadd.f32 %v532_v10, %v495_v0  ;;  %v537_v43 = vadd.f32 %v533_v6, %v496_v52  ;;  %v2117_v28 = vadd.f32 %v851_v3, %v831_v49  ;;  %v2119_v56 = vadd.f32 %v852_v14, %v832_v40 }
 0x34a   :  { %v829_v13 = vadd.f32 %v825_v57, %v2285_v24 }
 0x34b   :  { %v577_v7 = vadd.f32 %v573_v61, %v536_v26  ;;  %v578_v2 = vadd.f32 %v574_v1, %v537_v43  ;;  %v838_v48 = vpop.permute.xlu1 %837  ;;  %v880_v54 = vadd.f32 %v2119_v56, %v2117_v28  ;;  %v887_v60 = vmul.f32 %v2117_v28, %v2117_v28 }
 0x34c   :  { %v841_v21 = vsel %vm628_vm8, %v834_v39, %v838_v48  ;;  %v843_v34 = vsel %vm628_vm8, %v838_v48, %v834_v39  ;;  %v888_v31 = vmul.f32 %v2119_v56, %v2119_v56 }
 0x34d   :  { %v618_v62 = vadd.f32 %v614_v20, %v577_v7  ;;  %v619_v37 = vadd.f32 %v615_v15, %v578_v2  ;;  %v845_v51 = vmul.f32 %v841_v21, %v2284_v29  ;;  %v846_v27 = vmul.f32 %v843_v34, %v2284_v29  ;;  %881 = vadd.xlane.f32.xlu1 %v880_v54  ;;  %v858_v2 = vld [vmem:[%s2229_s6 + $0x8] sm:$0xff]  ;;  %v857_v54 = vld [vmem:[%s2229_s6] sm:$0xff] }
 0x34e   :  { %v892_v45 = vadd.f32 %v888_v31, %v887_v60  ;;  %v859_v34 = vld [vmem:[%s2230_s7] sm:$0xff] }
 0x34f   :  { %v849_v16 = vmul.f32 %v1898_v58, %v845_v51  ;;  %v850_v33 = vmul.f32 %v2283_v55, %v846_v27  ;;  %v2141_v19 = vadd.f32 %v655_v12, %v618_v62  ;;  %v2143_v59 = vadd.f32 %v656_v42, %v619_v37  ;;  %v2288_v58 = vld [vmem:[#allocation22_spill] sm:$0xff] }
 0x350   :  { %v868_v11 = vmul.f32 %v2288_v58, %v2288_v58  ;;  %v860_v51 = vld [vmem:[%s2230_s7 + $0x8] sm:$0xff] }
 0x351   :  { %v869_v9 = vmul.f32 %v2141_v19, %v2141_v19  ;;  %v870_v38 = vmul.f32 %v2143_v59, %v2143_v59  ;;  %v2149_v17 = vadd.f32 %v849_v16, %v829_v13  ;;  %v2151_v23 = vadd.f32 %v850_v33, %v830_v22 }
 0x352   :  { %v871_v53 = vadd.f32 %v868_v11, %v867_v25  ;;  %v864_v32 = vadd.f32 %v2143_v59, %v2141_v19 }
 0x353   :  { %v874_v18 = vadd.f32 %v870_v38, %v869_v9  ;;  %v877_v47 = vadd.f32 %v2151_v23, %v2149_v17  ;;  %v885_v30 = vmul.f32 %v2149_v17, %v2149_v17  ;;  %v886_v35 = vmul.f32 %v2151_v23, %v2151_v23 }
 0x355   :  { %875 = vadd.xlane.f32.xlu1 %v874_v18  ;;  %878 = vadd.xlane.f32.xlu0 %v877_v47  ;;  %v889_v5 = vadd.f32 %v886_v35, %v885_v30 }
 0x359   :  { %893 = vadd.xlane.f32.xlu1 %v892_v45  ;;  %872 = vadd.xlane.f32.xlu0 %v871_v53 }
 0x35d   :  { %865 = vadd.xlane.f32.xlu0 %v864_v32 }
 0x361   :  { %890 = vadd.xlane.f32.xlu0 %v889_v5 }
 0x3b2   :  { %v863_v46 = vpop.xlane.xlu1 %862 }
 0x3da   :  { %v882_v63 = vpop.xlane.xlu1 %881 }
 0x3e2   :  { %v879_v36 = vpop.xlane.xlu0 %878  ;;  %v876_v3 = vpop.xlane.xlu1 %875 }
 0x3e3   :  { %v883_v0 = vadd.f32 %v879_v36, %v863_v46 }
 0x3e5   :  { %v897_v39 = vmul.f32 0.001953125, %v883_v0 }
 0x3e6   :  { %v873_v55 = vpop.xlane.xlu0 %872  ;;  %v894_v14 = vpop.xlane.xlu1 %893 }
 0x3e7   :  { %v896_v10 = vadd.f32 %v894_v14, %v876_v3  ;;  %v901_v50 = vmul.f32 %v897_v39, %v897_v39 }
 0x3e9   :  { %v900_v61 = vmul.f32 0.001953125, %v896_v10 }
 0x3ea   :  { %v866_v52 = vpop.xlane.xlu0 %865 }
 0x3eb   :  { %v884_v6 = vadd.f32 %v882_v63, %v866_v52 }
 0x3ed   :  { %v898_v49 = vmul.f32 0.001953125, %v884_v6 }
 0x3ee   :  { %v891_v40 = vpop.xlane.xlu0 %890 }
 0x3ef   :  { %v902_v1 = vmul.f32 %v898_v49, %v898_v49  ;;  %v895_v44 = vadd.f32 %v891_v40, %v873_v55 }
 0x3f1   :  { %v904_v26 = vsub.f32 %v900_v61, %v902_v1  ;;  %v899_v43 = vmul.f32 0.001953125, %v895_v44 }
 0x3f3   :  { %v906_v57 = vmax.f32 %v904_v26, 0.0  ;;  %v903_v4 = vsub.f32 %v899_v43, %v901_v50 }
 0x3f5   :  { %v908_v20 = vadd.f32 1e-05, %v906_v57  ;;  %v905_v15 = vmax.f32 %v903_v4, 0.0 }
 0x3f7   :  { %1237 = vrsqrt.f32 %v908_v20  ;;  %v907_v7 = vadd.f32 1e-05, %v905_v15 }
 0x3f9   :  { %1239 = vrsqrt.f32 %v907_v7 }
 0x401   :  { %v1238_v48 = vpop.eup %1237 }
 0x402   :  { %v912_v12 = vmul.f32 %v1238_v48, %v858_v2 }
 0x403   :  { %v1240_v42 = vpop.eup %1239 }
 0x404   :  { %924 = vperm.xlu1 %1232, %v912_v12   ;;  %v911_v21 = vmul.f32 %v1240_v42, %v857_v54  ;;  %v914_v37 = vmul.f32 %v912_v12, %v898_v49 }
 0x406   :  { %919 = vperm.xlu0 %1231, %v911_v21   ;;  %v913_v62 = vmul.f32 %v911_v21, %v897_v39  ;;  %v916_v27 = vsub.f32 %v860_v51, %v914_v37  ;;  %v1107_v21 = vld [vmem:[%s2232_s9] sm:$0xff] }
 0x407   :  { %v1108_v37 = vld [vmem:[%s2233_s10] sm:$0xff] }
 0x408   :  { %v915_v29 = vsub.f32 %v859_v34, %v913_v62 }
 0x40a   :  { %933 = vperm.xlu1 %1232, %v915_v29  }
 0x40e   :  { %938 = vperm.xlu1 %1232, %v916_v27  }
 0x483   :  { %v925_v24 = vpop.permute.xlu1 %924 }
 0x484   :  { %v929_v47 = vmul.f32 %v925_v24, %v2141_v19  ;;  %v930_v60 = vmul.f32 %v925_v24, %v2143_v59  ;;  %v951_v31 = vmul.f32 %v925_v24, %v2117_v28  ;;  %v952_v45 = vmul.f32 %v925_v24, %v2119_v56  ;;  %v51_v28 = vld [vmem:[%s2231_s8] sm:$0xff] }
 0x485   :  { %v920_v13 = vpop.permute.xlu0 %919 }
 0x486   :  { %v927_v41 = vmul.f32 %v920_v13, %v2287_v8  ;;  %v928_v22 = vmul.f32 %v920_v13, %v2288_v58  ;;  %v949_v16 = vmul.f32 %v920_v13, %v2149_v17  ;;  %v950_v33 = vmul.f32 %v920_v13, %v2151_v23 }
 0x489   :  { %v934_v9 = vpop.permute.xlu1 %933 }
 0x48a   :  { %v941_v38 = vadd.f32 %v934_v9, %v927_v41  ;;  %v942_v25 = vadd.f32 %v934_v9, %v928_v22  ;;  %v953_v11 = vadd.f32 %v949_v16, %v934_v9  ;;  %v954_v18 = vadd.f32 %v950_v33, %v934_v9 }
 0x48c   :  { %v945_v30 = vmax.f32 %v941_v38, 0.0  ;;  %v957_v23 = vmax.f32 %v953_v11, 0.0  ;;  %v946_v35 = vmax.f32 %v942_v25, 0.0  ;;  %v958_v5 = vmax.f32 %v954_v18, 0.0  ;;  %v1243_v11 = vld [vmem:[%s2223_s0] sm:$0xff] }
 0x48d   :  { %v939_v8 = vpop.permute.xlu1 %938 }
 0x48e   :  { %v943_v53 = vadd.f32 %v939_v8, %v929_v47  ;;  %v944_v58 = vadd.f32 %v939_v8, %v930_v60  ;;  %v955_v32 = vadd.f32 %v951_v31, %v939_v8  ;;  %v956_v17 = vadd.f32 %v952_v45, %v939_v8  ;;  %v1244_v47 = vld [vmem:[%s2223_s0 + $0x8] sm:$0xff]  ;;  %v1245_v31 = vld [vmem:[%s2223_s0 + $0x10] sm:$0xff]  ;;  %v1246_v8 = vld [vmem:[%s2223_s0 + $0x18] sm:$0xff] }
 0x490   :  { %v947_v46 = vmax.f32 %v943_v53, 0.0  ;;  %v959_v63 = vmax.f32 %v955_v32, 0.0  ;;  %v948_v36 = vmax.f32 %v944_v58, 0.0  ;;  %v960_v3 = vmax.f32 %v956_v17, 0.0 }
 0x492   :  { %v1188_v19 = vpack.c.bf16 %v948_v36, %v946_v35  ;;  %v1192_v55 = vpack.c.bf16 %v960_v3, %v958_v5  ;;  %v1190_v59 = vpack.c.bf16 %v947_v46, %v945_v30  ;;  %v1194_v14 = vpack.c.bf16 %v959_v63, %v957_v23 }
 0x494   :  { %1189 = vmatprep.subr.bf16.mxu0 %v1188_v19  ;;  %1193 = vmatprep.subr.bf16.mxu1 %v1192_v55 }
 0x495   :  { %1191 = vmatpush1.bf16.msra.mxu0 %v1190_v59  ;;  %1195 = vmatpush1.bf16.msra.mxu1 %v1194_v14 }
 0x498   :  { %1186 = vmatmul.mubr.msk.f32.vlgmr.msra.gmra.mrb[4].mxu0 %vm961_vm9, %v51_v28  ;;  %1187 = vmatmul.mubr.msk.f32.vlgmr.msra.gmra.mrb[4].mxu1 %vm961_vm9, %v51_v28 }
 0x56b   :  { %v1031_v56 = vpop.f32.mrb[4].mxu0  ;;  %v1102_v0 = vpop.f32.mrb[4].mxu1 }
 0x56c   :  { %v1112_v52 = vmul.f32 %v1031_v56, %v1031_v56  ;;  %v1033_v10 = vpop.f32.mrb[5].mxu0  ;;  %v1121_v6 = vmul.f32 %v1102_v0, %v1102_v0  ;;  %v1104_v39 = vpop.f32.mrb[5].mxu1 }
 0x56d   :  { %v1109_v49 = vadd.f32 %v1033_v10, %v1031_v56  ;;  %v1113_v40 = vmul.f32 %v1033_v10, %v1033_v10  ;;  %v1122_v61 = vmul.f32 %v1104_v39, %v1104_v39  ;;  %v1117_v1 = vadd.f32 %v1104_v39, %v1102_v0 }
 0x56f   :  { %v1114_v44 = vadd.f32 %v1113_v40, %v1112_v52  ;;  %1110 = vadd.xlane.f32.xlu1 %v1109_v49  ;;  %v1123_v50 = vadd.f32 %v1122_v61, %v1121_v6  ;;  %1118 = vadd.xlane.f32.xlu0 %v1117_v1 }
 0x573   :  { %1115 = vadd.xlane.f32.xlu1 %v1114_v44 }
 0x577   :  { %1124 = vadd.xlane.f32.xlu1 %v1123_v50 }
 0x5fc   :  { %v1111_v26 = vpop.xlane.xlu1 %1110  ;;  %v1119_v43 = vpop.xlane.xlu0 %1118 }
 0x5fd   :  { %v1120_v57 = vadd.f32 %v1119_v43, %v1111_v26 }
 0x5ff   :  { %v1127_v20 = vmul.f32 0.001953125, %v1120_v57 }
 0x600   :  { %v1116_v4 = vpop.xlane.xlu1 %1115 }
 0x601   :  { %v1129_v2 = vmul.f32 %v1127_v20, %v1127_v20 }
 0x604   :  { %v1125_v15 = vpop.xlane.xlu1 %1124 }
 0x605   :  { %v1126_v7 = vadd.f32 %v1125_v15, %v1116_v4 }
 0x607   :  { %v1128_v48 = vmul.f32 0.001953125, %v1126_v7 }
 0x609   :  { %v1130_v54 = vsub.f32 %v1128_v48, %v1129_v2 }
 0x60b   :  { %v1131_v12 = vmax.f32 %v1130_v54, 0.0 }
 0x60d   :  { %v1132_v42 = vadd.f32 1e-05, %v1131_v12 }
 0x60f   :  { %1241 = vrsqrt.f32 %v1132_v42 }
 0x619   :  { %v1242_v34 = vpop.eup %1241 }
 0x61a   :  { %v1134_v62 = vmul.f32 %v1242_v34, %v1107_v21 }
 0x61c   :  { %1139 = vperm.xlu1 %1232, %v1134_v62   ;;  %v1135_v29 = vmul.f32 %v1134_v62, %v1127_v20 }
 0x61e   :  { %v1136_v51 = vsub.f32 %v1108_v37, %v1135_v29 }
 0x620   :  { %1146 = vperm.xlu0 %1231, %v1136_v51  }
 0x69b   :  { %v1140_v27 = vpop.permute.xlu1 %1139 }
 0x69c   :  { %v1142_v24 = vmul.f32 %v1140_v27, %v1031_v56  ;;  %v1143_v13 = vmul.f32 %v1140_v27, %v1033_v10  ;;  %v1151_v41 = vmul.f32 %v1140_v27, %v1102_v0  ;;  %v1152_v22 = vmul.f32 %v1140_v27, %v1104_v39 }
 0x69f   :  { %v1147_v16 = vpop.permute.xlu0 %1146 }
 0x6a0   :  { %v1149_v33 = vadd.f32 %v1147_v16, %v1142_v24  ;;  %v1150_v9 = vadd.f32 %v1147_v16, %v1143_v13  ;;  %v1153_v38 = vadd.f32 %v1151_v41, %v1147_v16  ;;  %v1154_v25 = vadd.f32 %v1152_v22, %v1147_v16 }
 0x6a2   :  { %v1155_v18 = vadd.f32 %v1243_v11, %v1149_v33  ;;  %v1156_v60 = vadd.f32 %v1244_v47, %v1150_v9  ;;  %v1159_v45 = vadd.f32 %v1245_v31, %v1153_v38  ;;  %v1160_v53 = vadd.f32 %v1246_v8, %v1154_v25 }
 0x6a4   :  { %1157 = vst [vmem:[#allocation2] sm:$0xff] %v1155_v18  ;;  %1158 = vst [vmem:[#allocation2 + $0x8] sm:$0xff] %v1156_v60 }
 0x6a5   :  { %1162 = vst [vmem:[#allocation2 + $0x10] sm:$0xff] %v1159_v45  ;;  %1163 = vst [vmem:[#allocation2 + $0x18] sm:$0xff] %v1160_v53 }
 0x6a6   :  { %1258 = shalt.err (!%p1255_p4)
}
 0x6a7   :  { %s1259_s2 = scalar_lea.hbm %s2234_s11, 512 }
 0x6a8   :  { %p1260_p5 = scmp.ne.s32.totalorder %s2234_s11, %s1259_s2  ;;  %p1263_p6 = scmp.lt.u32.totalorder %s1259_s2, %s2234_s11 }
 0x6aa   :  { %p1265_p7 = pnand %p1263_p6, %p1260_p5 }
 0x6ac   :  { %1268 = shalt.err (!%p1265_p7)
}
 0x6ad   :  { %s1290_s15 = smov 256  }
 0x6ae   :  { %1175 = dma.vmem_to_hbm [thread:$0]  %s1170_s23, 512, %s2234_s11, [#allocation3], %s1290_s15, %s1290_s15, %s1282_s4  }
 0x6af   :  { %1269 = dma.done.wait [#allocation3], 512  }
 0x6b0   :  { %1270 = vsyncadd [#allocation3], 4294966784 }
 0x6b1   :  { %1179 = vsyncpa [#allocation3], 1 }

</bundles_post_ra>
